<compile_context>
chip_gen: v7x
topology: tpu7x:2x2x1
jax: 0.10.0
libtpu: 0.0.40
codegen_flags: <defaults>
</compile_context>

<pallas_src>
import math
import numpy as np
import jax
import jax.numpy as jnp
from jax.experimental import pallas as pl
from jax.experimental.pallas import tpu as pltpu

# ---------------- config (small, consistent with the module) ----------------
BATCH = 8
INPUT_DIM = 16          # obs dim
OUTPUT_DIM = 8          # flow dim (must be even)
NZ_MID_PRIOR = 16       # cond dim == Predictor mid/out size
N_FLOW_LAYERS = 2
HIDDEN_DIM = 32         # RealNVP FCNN hidden
HALF = OUTPUT_DIM // 2
FCNN_IN = HALF + NZ_MID_PRIOR
LEAKY_SLOPE = 0.01      # PyTorch LeakyReLU default
LOG_2PI = math.log(2.0 * math.pi)

H2 = 2 * HIDDEN_DIM                 # fused (t|s) hidden width = 64
N_STEPS = N_FLOW_LAYERS * 2         # one "step" = one coupling half (t & s fused)
SLAB_LANES = N_STEPS * H2           # 256 lanes (one MXU pass on v6e/v7x)


def _round8(n):
    return ((n + 7) // 8) * 8


# ---- single merged weight slab row layout (width = SLAB_LANES = 256) --------
# All bias rows and weight-block starts are 8-row (sublane) aligned.
RC_W0 = 0                                   # (INPUT_DIM, NZ_MID_PRIOR)   cols [0,16)
RC_W1 = _round8(RC_W0 + INPUT_DIM)          # (NZ_MID_PRIOR, NZ_MID_PRIOR) cols [0,16)
RC_B0 = _round8(RC_W1 + NZ_MID_PRIOR)       # 1 row, cols [0,16)
RC_B1 = RC_B0 + 8                           # 1 row, cols [0,16)
R_PW  = RC_B1 + 8                           # (NZ_MID_PRIOR, 256) = cw2 @ [W1C_0|..|W1C_3]
R_PB  = _round8(R_PW + NZ_MID_PRIOR)        # 1 row, cols [0,256)
R_W1I = R_PB + 8                            # (HALF, 256): step st in cols [st*H2,(st+1)*H2)
R_W2  = _round8(R_W1I + HALF)               # (H2, 256): step st block-diag in its H2 lanes
R_B2  = R_W2 + H2                           # 1 row
R_W3  = R_B2 + 8                            # (H2, 256): step st in cols [st*2*HALF, ...)
R_B3  = R_W3 + H2                           # 1 row
SLAB_ROWS = _round8(R_B3 + 1)               # 224


# ------------------------------ Pallas kernel --------------------------------
def _flow_logprob_kernel(obs_ref, x_ref, w_ref, out_ref):
    f32 = jnp.float32
    slope = jnp.float32(LEAKY_SLOPE)

    def lrelu(v):
        return jnp.where(v > 0, v, slope * v)

    # ---- conditioning net (first two layers; final layer is folded below) ----
    obs = obs_ref[...]
    h = lrelu(jnp.dot(obs, w_ref[RC_W0:RC_W0 + INPUT_DIM, 0:NZ_MID_PRIOR],
                      preferred_element_type=f32)
              + w_ref[RC_B0:RC_B0 + 1, 0:NZ_MID_PRIOR])
    h = lrelu(jnp.dot(h, w_ref[RC_W1:RC_W1 + NZ_MID_PRIOR, 0:NZ_MID_PRIOR],
                      preferred_element_type=f32)
              + w_ref[RC_B1:RC_B1 + 1, 0:NZ_MID_PRIOR])

    # ---- ONE lane-dense (B, 256) matmul = folded cw2/cb2 + all 4 per-step
    #      cond projections (bias folded in) ----
    proj_all = jnp.dot(h, w_ref[R_PW:R_PW + NZ_MID_PRIOR, :],
                       preferred_element_type=f32) + w_ref[R_PB:R_PB + 1, :]

    # ---- normalizing flow (t/s fused per coupling half) ----
    x = x_ref[...]
    lower = x[:, :HALF]
    upper = x[:, HALF:]
    log_det = jnp.zeros((x.shape[0], 1), f32)

    for l in range(N_FLOW_LAYERS):
        for half in range(2):
            st = 2 * l + half
            c0 = st * H2
            inp = lower if half == 0 else upper

            # K=4 first layer kept OFF the MXU: 4 broadcast multiply-adds (VPU)
            pre = proj_all[:, c0:c0 + H2]
            w1i = w_ref[R_W1I:R_W1I + HALF, c0:c0 + H2]
            for k in range(HALF):
                pre = pre + inp[:, k:k + 1] * w1i[k:k + 1, :]
            h1 = jnp.tanh(pre)

            h2 = jnp.tanh(jnp.dot(h1, w_ref[R_W2:R_W2 + H2, c0:c0 + H2],
                                  preferred_element_type=f32)
                          + w_ref[R_B2:R_B2 + 1, c0:c0 + H2])

            cts = st * 2 * HALF
            ts = jnp.dot(h2, w_ref[R_W3:R_W3 + H2, cts:cts + 2 * HALF],
                         preferred_element_type=f32) \
                 + w_ref[R_B3:R_B3 + 1, cts:cts + 2 * HALF]
            t = ts[:, :HALF]
            s = ts[:, HALF:]
            if half == 0:
                upper = t + upper * jnp.exp(s)
            else:
                lower = t + lower * jnp.exp(s)
            log_det = log_det + jnp.sum(s, axis=1, keepdims=True)

    # prior log-prob: per-half reductions, log(2*pi) folded at trace time
    prior = (-0.5 * (jnp.sum(lower * lower, axis=1, keepdims=True)
                     + jnp.sum(upper * upper, axis=1, keepdims=True))
             - 0.5 * OUTPUT_DIM * LOG_2PI)
    # lane-dense (B, 128) store (unmasked vst); lane 0 holds the result
    out_ref[...] = jnp.broadcast_to(prior + log_det, out_ref.shape)


def flow_log_prob(slab, obs, x, *, block_b=512):
    """log_prob of FlowDistributionWrapper returned by ConditionedFlowModel(obs)."""
    B = obs.shape[0]
    bb = min(block_b, _round8(B))          # batch tile (multiple of 8)
    nb = pl.cdiv(B, bb)
    Bp = nb * bb
    if Bp != B:                            # pad batch up to a tile multiple
        obs = jnp.pad(obs, ((0, Bp - B), (0, 0)))
        x = jnp.pad(x, ((0, Bp - B), (0, 0)))

    out = pl.pallas_call(
        _flow_logprob_kernel,
        out_shape=jax.ShapeDtypeStruct((Bp, 128), jnp.float32),
        grid_spec=pltpu.PrefetchScalarGridSpec(
            num_scalar_prefetch=0,
            grid=(nb,),
            in_specs=[
                pl.BlockSpec((bb, INPUT_DIM), lambda i: (i, 0)),
                pl.BlockSpec((bb, OUTPUT_DIM), lambda i: (i, 0)),
                # weight slab: constant index_map -> stays VMEM-resident
                pl.BlockSpec((SLAB_ROWS, SLAB_LANES), lambda i: (0, 0)),
            ],
            out_specs=pl.BlockSpec((bb, 128), lambda i: (i, 0)),
        ),
        compiler_params=pltpu.CompilerParams(dimension_semantics=("parallel",)),
    )(obs, x, slab)
    return out[:B, 0]


# --------------------------- host-side weight packing -------------------------
def pack_params(p):
    """Pack natural per-layer params into one pre-laid-out f32 slab.

    Folds the cond-net's final Linear (cw2, cb2) and every per-step cond
    projection (cond part of fused W1 + b1) into a single (16, 256) matrix and
    (1, 256) bias.  Exact in f32.
    """
    slab = np.zeros((SLAB_ROWS, SLAB_LANES), np.float32)

    cw0 = np.asarray(p["cw0"]); cb0 = np.asarray(p["cb0"])
    cw1 = np.asarray(p["cw1"]); cb1 = np.asarray(p["cb1"])
    cw2 = np.asarray(p["cw2"]); cb2 = np.asarray(p["cb2"])
    slab[RC_W0:RC_W0 + INPUT_DIM, :NZ_MID_PRIOR] = cw0
    slab[RC_W1:RC_W1 + NZ_MID_PRIOR, :NZ_MID_PRIOR] = cw1
    slab[RC_B0, :NZ_MID_PRIOR] = cb0[0]
    slab[RC_B1, :NZ_MID_PRIOR] = cb1[0]

    fw1 = np.asarray(p["fw1"]); fb1 = np.asarray(p["fb1"])
    fw2 = np.asarray(p["fw2"]); fb2 = np.asarray(p["fb2"])
    fw3 = np.asarray(p["fw3"]); fb3 = np.asarray(p["fb3"])

    for l in range(N_FLOW_LAYERS):
        for half in range(2):
            st = 2 * l + half
            ti, si = 2 * half, 2 * half + 1        # (t1, s1, t2, s2) ordering
            c0 = st * H2

            # fused first layer: columns = [t-net | s-net]
            w1f = np.concatenate([fw1[l, ti], fw1[l, si]], axis=1)   # (FCNN_IN, H2)
            b1f = np.concatenate([fb1[l, ti], fb1[l, si]], axis=1)   # (1, H2)

            # cond part folded with cw2/cb2 -> one lane-dense projection matmul
            w1c = w1f[HALF:]                                         # (NZ_MID, H2)
            slab[R_PW:R_PW + NZ_MID_PRIOR, c0:c0 + H2] = cw2 @ w1c
            slab[R_PB, c0:c0 + H2] = (cb2 @ w1c + b1f)[0]

            # input part of fused first layer (used via VPU multiply-adds)
            slab[R_W1I:R_W1I + HALF, c0:c0 + H2] = w1f[:HALF]

            # fused second layer: block-diagonal
            slab[R_W2:R_W2 + HIDDEN_DIM, c0:c0 + HIDDEN_DIM] = fw2[l, ti]
            slab[R_W2 + HIDDEN_DIM:R_W2 + H2, c0 + HIDDEN_DIM:c0 + H2] = fw2[l, si]
            slab[R_B2, c0:c0 + HIDDEN_DIM] = fb2[l, ti][0]
            slab[R_B2, c0 + HIDDEN_DIM:c0 + H2] = fb2[l, si][0]

            # fused output layer: t -> lanes [0,HALF), s -> lanes [HALF,2*HALF)
            cts = st * 2 * HALF
            slab[R_W3:R_W3 + HIDDEN_DIM, cts:cts + HALF] = fw3[l, ti]
            slab[R_W3 + HIDDEN_DIM:R_W3 + H2, cts + HALF:cts + 2 * HALF] = fw3[l, si]
            slab[R_B3, cts:cts + HALF] = fb3[l, ti][0]
            slab[R_B3, cts + HALF:cts + 2 * HALF] = fb3[l, si][0]

    return jnp.asarray(slab)


# --------------------------- thin wrapper (API parity) -----------------------
class FlowDistributionWrapperJAX:
    """Mirrors FlowDistributionWrapper: lazy log_prob / nll given cond source."""

    def __init__(self, slab, obs):
        self._slab = slab
        self._obs = obs

    def log_prob(self, x):
        return flow_log_prob(self._slab, self._obs, x)

    def nll(self, x):
        return -1.0 * self.log_prob(x)


class ConditionedFlowModelJAX:
    def __init__(self, params):
        self._slab = pack_params(params)   # pack once, host-side

    def forward(self, obs):
        return FlowDistributionWrapperJAX(self._slab, obs)


# ------------------------------ parameter init -------------------------------
def _init_linear(key, in_dim, out_dim):
    k1, k2 = jax.random.split(key)
    bound = 1.0 / np.sqrt(in_dim)  # torch.nn.Linear default init
    w = jax.random.uniform(k1, (in_dim, out_dim), jnp.float32, -bound, bound)
    b = jax.random.uniform(k2, (1, out_dim), jnp.float32, -bound, bound)
    return w, b


def init_params(key):
    keys = jax.random.split(key, 3 + N_FLOW_LAYERS * 4 * 3)
    ki = iter(keys)
    cw0, cb0 = _init_linear(next(ki), INPUT_DIM, NZ_MID_PRIOR)
    cw1, cb1 = _init_linear(next(ki), NZ_MID_PRIOR, NZ_MID_PRIOR)
    cw2, cb2 = _init_linear(next(ki), NZ_MID_PRIOR, NZ_MID_PRIOR)
    fw1, fb1, fw2, fb2, fw3, fb3 = [], [], [], [], [], []
    for _ in range(N_FLOW_LAYERS):
        for _ in range(4):                       # (t1, s1, t2, s2)
            w, b = _init_linear(next(ki), FCNN_IN, HIDDEN_DIM)
            fw1.append(w); fb1.append(b)
            w, b = _init_linear(next(ki), HIDDEN_DIM, HIDDEN_DIM)
            fw2.append(w); fb2.append(b)
            w, b = _init_linear(next(ki), HIDDEN_DIM, HALF)
            fw3.append(w); fb3.append(b)

    def stack(lst, *trailing):
        return jnp.stack(lst).reshape(N_FLOW_LAYERS, 4, *trailing)

    return dict(
        cw0=cw0, cb0=cb0, cw1=cw1, cb1=cb1, cw2=cw2, cb2=cb2,
        fw1=stack(fw1, FCNN_IN, HIDDEN_DIM), fb1=stack(fb1, 1, HIDDEN_DIM),
        fw2=stack(fw2, HIDDEN_DIM, HIDDEN_DIM), fb2=stack(fb2, 1, HIDDEN_DIM),
        fw3=stack(fw3, HIDDEN_DIM, HALF), fb3=stack(fb3, 1, HALF),
    )


# ------------------------------ pure-JAX reference ---------------------------
def _ref_log_prob(p, obs, x):
    def lrelu(v):
        return jnp.where(v > 0, v, LEAKY_SLOPE * v)
    h = lrelu(obs @ p["cw0"] + p["cb0"])
    h = lrelu(h @ p["cw1"] + p["cb1"])
    cond = h @ p["cw2"] + p["cb2"]

    lower, upper = x[:, :HALF], x[:, HALF:]
    log_det = jnp.zeros((x.shape[0],), jnp.float32)

    def fcnn(l, j, inp):
        z = jnp.concatenate([inp, cond], axis=-1)
        h1 = jnp.tanh(z @ p["fw1"][l, j] + p["fb1"][l, j])
        h2 = jnp.tanh(h1 @ p["fw2"][l, j] + p["fb2"][l, j])
        return h2 @ p["fw3"][l, j] + p["fb3"][l, j]

    for l in range(N_FLOW_LAYERS):
        t1, s1 = fcnn(l, 0, lower), fcnn(l, 1, lower)
        upper = t1 + upper * jnp.exp(s1)
        t2, s2 = fcnn(l, 2, upper), fcnn(l, 3, upper)
        lower = t2 + lower * jnp.exp(s2)
        log_det = log_det + jnp.sum(s1, axis=1) + jnp.sum(s2, axis=1)

    z = jnp.concatenate([lower, upper], axis=1)
    prior = jnp.sum(-0.5 * z * z - 0.5 * jnp.log(2.0 * jnp.pi), axis=1)
    return prior + log_det


# ----------------------------------- main -------------------------------------
if __name__ == "__main__":
    key = jax.random.PRNGKey(0)
    k_param, k_obs, k_x, k_obs2, k_x2 = jax.random.split(key, 5)

    params = init_params(k_param)
    model = ConditionedFlowModelJAX(params)

    # --- primary check: BATCH=8 (single grid step) ---
    obs = jax.random.normal(k_obs, (BATCH, INPUT_DIM), jnp.float32)
    x = jax.random.normal(k_x, (BATCH, OUTPUT_DIM), jnp.float32)

    dist = model.forward(obs)                # mirrors ConditionedFlowModel.forward
    logp = dist.log_prob(x)                  # Pallas kernel hot path
    logp = jax.block_until_ready(logp)

    ref = _ref_log_prob(params, obs, x)
    np.testing.assert_allclose(np.asarray(logp), np.asarray(ref),
                               rtol=1e-3, atol=1e-3)

    # --- secondary check: exercise the batch-tiled parallel grid (+ padding) ---
    B2 = 20
    obs2 = jax.random.normal(k_obs2, (B2, INPUT_DIM), jnp.float32)
    x2 = jax.random.normal(k_x2, (B2, OUTPUT_DIM), jnp.float32)
    logp2 = flow_log_prob(model._slab, obs2, x2, block_b=8)   # grid of 3 tiles
    logp2 = jax.block_until_ready(logp2)
    ref2 = _ref_log_prob(params, obs2, x2)
    np.testing.assert_allclose(np.asarray(logp2), np.asarray(ref2),
                               rtol=1e-3, atol=1e-3)

    print("KERNEL_OK")
</pallas_src>

<mosaic_0001>
module attributes {stable_mosaic.version = 11 : i64} {
  func.func @_flow_logprob_kernel(%arg0: i32, %arg1: memref<8x16xf32, #tpu.memory_space<vmem>>, %arg2: memref<8x8xf32, #tpu.memory_space<vmem>>, %arg3: memref<224x256xf32, #tpu.memory_space<vmem>>, %arg4: memref<8x128xf32, #tpu.memory_space<vmem>>) attributes {dimension_semantics = [#tpu.dimension_semantics<parallel>], iteration_bounds = array<i64: 1>, scalar_prefetch = 0 : i64, scratch_operands = 0 : i64, tpu.core_type = #tpu.core_type<tc>, window_params = [{transform_indices = @transform_0, window_bounds = array<i64: 8, 16>}, {transform_indices = @transform_1, window_bounds = array<i64: 8, 8>}, {pipeline_mode = #tpu.pipeline_mode<synchronous>, transform_indices = @transform_2, window_bounds = array<i64: 224, 256>}, {transform_indices = @transform_3, window_bounds = array<i64: 8, 128>}]} {
    %c0 = arith.constant 0 : index
    %c0_0 = arith.constant 0 : index
    %0 = vector.load %arg1[%c0, %c0_0] : memref<8x16xf32, #tpu.memory_space<vmem>>, vector<8x16xf32>
    %c0_1 = arith.constant 0 : index
    %c0_2 = arith.constant 0 : index
    %1 = vector.load %arg3[%c0_1, %c0_2] : memref<224x256xf32, #tpu.memory_space<vmem>>, vector<16x16xf32>
    %cst = arith.constant dense<0.000000e+00> : vector<8x16xf32>
    %2 = tpu.matmul %0, %1, %cst {dimension_numbers = #tpu.dot_dimension_numbers<[1], [0], [0], [1], [0, 0, 1, 1], [], []>} : vector<8x16xf32>, vector<16x16xf32>, vector<8x16xf32> -> vector<8x16xf32>
    %c32 = arith.constant 32 : index
    %c0_3 = arith.constant 0 : index
    %3 = vector.load %arg3[%c32, %c0_3] : memref<224x256xf32, #tpu.memory_space<vmem>>, vector<1x16xf32>
    %4 = vector.broadcast %3 : vector<1x16xf32> to vector<8x16xf32>
    %5 = arith.addf %2, %4 : vector<8x16xf32>
    %cst_4 = arith.constant 0.000000e+00 : f32
    %6 = vector.broadcast %cst_4 : f32 to vector<8x16xf32>
    %7 = arith.cmpf ogt, %5, %6 : vector<8x16xf32>
    %cst_5 = arith.constant 0.00999999977 : f32
    %8 = vector.broadcast %cst_5 : f32 to vector<8x16xf32>
    %9 = arith.mulf %8, %5 : vector<8x16xf32>
    %10 = arith.select %7, %5, %9 : vector<8x16xi1>, vector<8x16xf32>
    %c16 = arith.constant 16 : index
    %c0_6 = arith.constant 0 : index
    %11 = vector.load %arg3[%c16, %c0_6] : memref<224x256xf32, #tpu.memory_space<vmem>>, vector<16x16xf32>
    %cst_7 = arith.constant dense<0.000000e+00> : vector<8x16xf32>
    %12 = tpu.matmul %10, %11, %cst_7 {dimension_numbers = #tpu.dot_dimension_numbers<[1], [0], [0], [1], [0, 0, 1, 1], [], []>} : vector<8x16xf32>, vector<16x16xf32>, vector<8x16xf32> -> vector<8x16xf32>
    %c40 = arith.constant 40 : index
    %c0_8 = arith.constant 0 : index
    %13 = vector.load %arg3[%c40, %c0_8] : memref<224x256xf32, #tpu.memory_space<vmem>>, vector<1x16xf32>
    %14 = vector.broadcast %13 : vector<1x16xf32> to vector<8x16xf32>
    %15 = arith.addf %12, %14 : vector<8x16xf32>
    %cst_9 = arith.constant 0.000000e+00 : f32
    %16 = vector.broadcast %cst_9 : f32 to vector<8x16xf32>
    %17 = arith.cmpf ogt, %15, %16 : vector<8x16xf32>
    %cst_10 = arith.constant 0.00999999977 : f32
    %18 = vector.broadcast %cst_10 : f32 to vector<8x16xf32>
    %19 = arith.mulf %18, %15 : vector<8x16xf32>
    %20 = arith.select %17, %15, %19 : vector<8x16xi1>, vector<8x16xf32>
    %c48 = arith.constant 48 : index
    %c0_11 = arith.constant 0 : index
    %21 = vector.load %arg3[%c48, %c0_11] : memref<224x256xf32, #tpu.memory_space<vmem>>, vector<16x256xf32>
    %cst_12 = arith.constant dense<0.000000e+00> : vector<8x256xf32>
    %22 = tpu.matmul %20, %21, %cst_12 {dimension_numbers = #tpu.dot_dimension_numbers<[1], [0], [0], [1], [0, 0, 1, 1], [], []>} : vector<8x16xf32>, vector<16x256xf32>, vector<8x256xf32> -> vector<8x256xf32>
    %c64 = arith.constant 64 : index
    %c0_13 = arith.constant 0 : index
    %23 = vector.load %arg3[%c64, %c0_13] : memref<224x256xf32, #tpu.memory_space<vmem>>, vector<1x256xf32>
    %24 = vector.broadcast %23 : vector<1x256xf32> to vector<8x256xf32>
    %25 = arith.addf %22, %24 : vector<8x256xf32>
    %c0_14 = arith.constant 0 : index
    %c0_15 = arith.constant 0 : index
    %26 = vector.load %arg2[%c0_14, %c0_15] : memref<8x8xf32, #tpu.memory_space<vmem>>, vector<8x8xf32>
    %27 = vector.extract_strided_slice %26 {offsets = [0, 0], sizes = [8, 4], strides = [1, 1]} : vector<8x8xf32> to vector<8x4xf32>
    %28 = vector.extract_strided_slice %26 {offsets = [0, 4], sizes = [8, 4], strides = [1, 1]} : vector<8x8xf32> to vector<8x4xf32>
    %cst_16 = arith.constant 0.000000e+00 : f32
    %29 = vector.broadcast %cst_16 : f32 to vector<8x1xf32>
    %30 = vector.extract_strided_slice %25 {offsets = [0, 0], sizes = [8, 64], strides = [1, 1]} : vector<8x256xf32> to vector<8x64xf32>
    %c72 = arith.constant 72 : index
    %c0_17 = arith.constant 0 : index
    %31 = vector.load %arg3[%c72, %c0_17] : memref<224x256xf32, #tpu.memory_space<vmem>>, vector<4x64xf32>
    %32 = vector.extract_strided_slice %27 {offsets = [0, 0], sizes = [8, 1], strides = [1, 1]} : vector<8x4xf32> to vector<8x1xf32>
    %33 = vector.extract_strided_slice %31 {offsets = [0, 0], sizes = [1, 64], strides = [1, 1]} : vector<4x64xf32> to vector<1x64xf32>
    %34 = vector.broadcast %32 : vector<8x1xf32> to vector<8x64xf32>
    %35 = vector.broadcast %33 : vector<1x64xf32> to vector<8x64xf32>
    %36 = arith.mulf %34, %35 : vector<8x64xf32>
    %37 = arith.addf %30, %36 : vector<8x64xf32>
    %38 = vector.extract_strided_slice %27 {offsets = [0, 1], sizes = [8, 1], strides = [1, 1]} : vector<8x4xf32> to vector<8x1xf32>
    %39 = vector.extract_strided_slice %31 {offsets = [1, 0], sizes = [1, 64], strides = [1, 1]} : vector<4x64xf32> to vector<1x64xf32>
    %40 = vector.broadcast %38 : vector<8x1xf32> to vector<8x64xf32>
    %41 = vector.broadcast %39 : vector<1x64xf32> to vector<8x64xf32>
    %42 = arith.mulf %40, %41 : vector<8x64xf32>
    %43 = arith.addf %37, %42 : vector<8x64xf32>
    %44 = vector.extract_strided_slice %27 {offsets = [0, 2], sizes = [8, 1], strides = [1, 1]} : vector<8x4xf32> to vector<8x1xf32>
    %45 = vector.extract_strided_slice %31 {offsets = [2, 0], sizes = [1, 64], strides = [1, 1]} : vector<4x64xf32> to vector<1x64xf32>
    %46 = vector.broadcast %44 : vector<8x1xf32> to vector<8x64xf32>
    %47 = vector.broadcast %45 : vector<1x64xf32> to vector<8x64xf32>
    %48 = arith.mulf %46, %47 : vector<8x64xf32>
    %49 = arith.addf %43, %48 : vector<8x64xf32>
    %50 = vector.extract_strided_slice %27 {offsets = [0, 3], sizes = [8, 1], strides = [1, 1]} : vector<8x4xf32> to vector<8x1xf32>
    %51 = vector.extract_strided_slice %31 {offsets = [3, 0], sizes = [1, 64], strides = [1, 1]} : vector<4x64xf32> to vector<1x64xf32>
    %52 = vector.broadcast %50 : vector<8x1xf32> to vector<8x64xf32>
    %53 = vector.broadcast %51 : vector<1x64xf32> to vector<8x64xf32>
    %54 = arith.mulf %52, %53 : vector<8x64xf32>
    %55 = arith.addf %49, %54 : vector<8x64xf32>
    %56 = math.tanh %55 : vector<8x64xf32>
    %c80 = arith.constant 80 : index
    %c0_18 = arith.constant 0 : index
    %57 = vector.load %arg3[%c80, %c0_18] : memref<224x256xf32, #tpu.memory_space<vmem>>, vector<64x64xf32>
    %cst_19 = arith.constant dense<0.000000e+00> : vector<8x64xf32>
    %58 = tpu.matmul %56, %57, %cst_19 {dimension_numbers = #tpu.dot_dimension_numbers<[1], [0], [0], [1], [0, 0, 1, 1], [], []>} : vector<8x64xf32>, vector<64x64xf32>, vector<8x64xf32> -> vector<8x64xf32>
    %c144 = arith.constant 144 : index
    %c0_20 = arith.constant 0 : index
    %59 = vector.load %arg3[%c144, %c0_20] : memref<224x256xf32, #tpu.memory_space<vmem>>, vector<1x64xf32>
    %60 = vector.broadcast %59 : vector<1x64xf32> to vector<8x64xf32>
    %61 = arith.addf %58, %60 : vector<8x64xf32>
    %62 = math.tanh %61 : vector<8x64xf32>
    %c152 = arith.constant 152 : index
    %c0_21 = arith.constant 0 : index
    %63 = vector.load %arg3[%c152, %c0_21] : memref<224x256xf32, #tpu.memory_space<vmem>>, vector<64x8xf32>
    %cst_22 = arith.constant dense<0.000000e+00> : vector<8x8xf32>
    %64 = tpu.matmul %62, %63, %cst_22 {dimension_numbers = #tpu.dot_dimension_numbers<[1], [0], [0], [1], [0, 0, 1, 1], [], []>} : vector<8x64xf32>, vector<64x8xf32>, vector<8x8xf32> -> vector<8x8xf32>
    %c216 = arith.constant 216 : index
    %c0_23 = arith.constant 0 : index
    %65 = vector.load %arg3[%c216, %c0_23] : memref<224x256xf32, #tpu.memory_space<vmem>>, vector<1x8xf32>
    %66 = vector.broadcast %65 : vector<1x8xf32> to vector<8x8xf32>
    %67 = arith.addf %64, %66 : vector<8x8xf32>
    %68 = vector.extract_strided_slice %67 {offsets = [0, 0], sizes = [8, 4], strides = [1, 1]} : vector<8x8xf32> to vector<8x4xf32>
    %69 = vector.extract_strided_slice %67 {offsets = [0, 4], sizes = [8, 4], strides = [1, 1]} : vector<8x8xf32> to vector<8x4xf32>
    %70 = math.exp %69 : vector<8x4xf32>
    %71 = arith.mulf %28, %70 : vector<8x4xf32>
    %72 = arith.addf %68, %71 : vector<8x4xf32>
    %cst_24 = arith.constant dense<0.000000e+00> : vector<8xf32>
    %73 = vector.multi_reduction <add>, %69, %cst_24 [1] : vector<8x4xf32> to vector<8xf32>
    %74 = vector.shape_cast %73 : vector<8xf32> to vector<8x1xf32>
    %75 = arith.addf %29, %74 : vector<8x1xf32>
    %76 = vector.extract_strided_slice %25 {offsets = [0, 64], sizes = [8, 64], strides = [1, 1]} : vector<8x256xf32> to vector<8x64xf32>
    %c72_25 = arith.constant 72 : index
    %c64_26 = arith.constant 64 : index
    %77 = vector.load %arg3[%c72_25, %c64_26] : memref<224x256xf32, #tpu.memory_space<vmem>>, vector<4x64xf32>
    %78 = vector.extract_strided_slice %72 {offsets = [0, 0], sizes = [8, 1], strides = [1, 1]} : vector<8x4xf32> to vector<8x1xf32>
    %79 = vector.extract_strided_slice %77 {offsets = [0, 0], sizes = [1, 64], strides = [1, 1]} : vector<4x64xf32> to vector<1x64xf32>
    %80 = vector.broadcast %78 : vector<8x1xf32> to vector<8x64xf32>
    %81 = vector.broadcast %79 : vector<1x64xf32> to vector<8x64xf32>
    %82 = arith.mulf %80, %81 : vector<8x64xf32>
    %83 = arith.addf %76, %82 : vector<8x64xf32>
    %84 = vector.extract_strided_slice %72 {offsets = [0, 1], sizes = [8, 1], strides = [1, 1]} : vector<8x4xf32> to vector<8x1xf32>
    %85 = vector.extract_strided_slice %77 {offsets = [1, 0], sizes = [1, 64], strides = [1, 1]} : vector<4x64xf32> to vector<1x64xf32>
    %86 = vector.broadcast %84 : vector<8x1xf32> to vector<8x64xf32>
    %87 = vector.broadcast %85 : vector<1x64xf32> to vector<8x64xf32>
    %88 = arith.mulf %86, %87 : vector<8x64xf32>
    %89 = arith.addf %83, %88 : vector<8x64xf32>
    %90 = vector.extract_strided_slice %72 {offsets = [0, 2], sizes = [8, 1], strides = [1, 1]} : vector<8x4xf32> to vector<8x1xf32>
    %91 = vector.extract_strided_slice %77 {offsets = [2, 0], sizes = [1, 64], strides = [1, 1]} : vector<4x64xf32> to vector<1x64xf32>
    %92 = vector.broadcast %90 : vector<8x1xf32> to vector<8x64xf32>
    %93 = vector.broadcast %91 : vector<1x64xf32> to vector<8x64xf32>
    %94 = arith.mulf %92, %93 : vector<8x64xf32>
    %95 = arith.addf %89, %94 : vector<8x64xf32>
    %96 = vector.extract_strided_slice %72 {offsets = [0, 3], sizes = [8, 1], strides = [1, 1]} : vector<8x4xf32> to vector<8x1xf32>
    %97 = vector.extract_strided_slice %77 {offsets = [3, 0], sizes = [1, 64], strides = [1, 1]} : vector<4x64xf32> to vector<1x64xf32>
    %98 = vector.broadcast %96 : vector<8x1xf32> to vector<8x64xf32>
    %99 = vector.broadcast %97 : vector<1x64xf32> to vector<8x64xf32>
    %100 = arith.mulf %98, %99 : vector<8x64xf32>
    %101 = arith.addf %95, %100 : vector<8x64xf32>
    %102 = math.tanh %101 : vector<8x64xf32>
    %c80_27 = arith.constant 80 : index
    %c64_28 = arith.constant 64 : index
    %103 = vector.load %arg3[%c80_27, %c64_28] : memref<224x256xf32, #tpu.memory_space<vmem>>, vector<64x64xf32>
    %cst_29 = arith.constant dense<0.000000e+00> : vector<8x64xf32>
    %104 = tpu.matmul %102, %103, %cst_29 {dimension_numbers = #tpu.dot_dimension_numbers<[1], [0], [0], [1], [0, 0, 1, 1], [], []>} : vector<8x64xf32>, vector<64x64xf32>, vector<8x64xf32> -> vector<8x64xf32>
    %c144_30 = arith.constant 144 : index
    %c64_31 = arith.constant 64 : index
    %105 = vector.load %arg3[%c144_30, %c64_31] : memref<224x256xf32, #tpu.memory_space<vmem>>, vector<1x64xf32>
    %106 = vector.broadcast %105 : vector<1x64xf32> to vector<8x64xf32>
    %107 = arith.addf %104, %106 : vector<8x64xf32>
    %108 = math.tanh %107 : vector<8x64xf32>
    %c152_32 = arith.constant 152 : index
    %c8 = arith.constant 8 : index
    %109 = vector.load %arg3[%c152_32, %c8] : memref<224x256xf32, #tpu.memory_space<vmem>>, vector<64x8xf32>
    %cst_33 = arith.constant dense<0.000000e+00> : vector<8x8xf32>
    %110 = tpu.matmul %108, %109, %cst_33 {dimension_numbers = #tpu.dot_dimension_numbers<[1], [0], [0], [1], [0, 0, 1, 1], [], []>} : vector<8x64xf32>, vector<64x8xf32>, vector<8x8xf32> -> vector<8x8xf32>
    %c216_34 = arith.constant 216 : index
    %c8_35 = arith.constant 8 : index
    %111 = vector.load %arg3[%c216_34, %c8_35] : memref<224x256xf32, #tpu.memory_space<vmem>>, vector<1x8xf32>
    %112 = vector.broadcast %111 : vector<1x8xf32> to vector<8x8xf32>
    %113 = arith.addf %110, %112 : vector<8x8xf32>
    %114 = vector.extract_strided_slice %113 {offsets = [0, 0], sizes = [8, 4], strides = [1, 1]} : vector<8x8xf32> to vector<8x4xf32>
    %115 = vector.extract_strided_slice %113 {offsets = [0, 4], sizes = [8, 4], strides = [1, 1]} : vector<8x8xf32> to vector<8x4xf32>
    %116 = math.exp %115 : vector<8x4xf32>
    %117 = arith.mulf %27, %116 : vector<8x4xf32>
    %118 = arith.addf %114, %117 : vector<8x4xf32>
    %cst_36 = arith.constant dense<0.000000e+00> : vector<8xf32>
    %119 = vector.multi_reduction <add>, %115, %cst_36 [1] : vector<8x4xf32> to vector<8xf32>
    %120 = vector.shape_cast %119 : vector<8xf32> to vector<8x1xf32>
    %121 = arith.addf %75, %120 : vector<8x1xf32>
    %122 = vector.extract_strided_slice %25 {offsets = [0, 128], sizes = [8, 64], strides = [1, 1]} : vector<8x256xf32> to vector<8x64xf32>
    %c72_37 = arith.constant 72 : index
    %c128 = arith.constant 128 : index
    %123 = vector.load %arg3[%c72_37, %c128] : memref<224x256xf32, #tpu.memory_space<vmem>>, vector<4x64xf32>
    %124 = vector.extract_strided_slice %118 {offsets = [0, 0], sizes = [8, 1], strides = [1, 1]} : vector<8x4xf32> to vector<8x1xf32>
    %125 = vector.extract_strided_slice %123 {offsets = [0, 0], sizes = [1, 64], strides = [1, 1]} : vector<4x64xf32> to vector<1x64xf32>
    %126 = vector.broadcast %124 : vector<8x1xf32> to vector<8x64xf32>
    %127 = vector.broadcast %125 : vector<1x64xf32> to vector<8x64xf32>
    %128 = arith.mulf %126, %127 : vector<8x64xf32>
    %129 = arith.addf %122, %128 : vector<8x64xf32>
    %130 = vector.extract_strided_slice %118 {offsets = [0, 1], sizes = [8, 1], strides = [1, 1]} : vector<8x4xf32> to vector<8x1xf32>
    %131 = vector.extract_strided_slice %123 {offsets = [1, 0], sizes = [1, 64], strides = [1, 1]} : vector<4x64xf32> to vector<1x64xf32>
    %132 = vector.broadcast %130 : vector<8x1xf32> to vector<8x64xf32>
    %133 = vector.broadcast %131 : vector<1x64xf32> to vector<8x64xf32>
    %134 = arith.mulf %132, %133 : vector<8x64xf32>
    %135 = arith.addf %129, %134 : vector<8x64xf32>
    %136 = vector.extract_strided_slice %118 {offsets = [0, 2], sizes = [8, 1], strides = [1, 1]} : vector<8x4xf32> to vector<8x1xf32>
    %137 = vector.extract_strided_slice %123 {offsets = [2, 0], sizes = [1, 64], strides = [1, 1]} : vector<4x64xf32> to vector<1x64xf32>
    %138 = vector.broadcast %136 : vector<8x1xf32> to vector<8x64xf32>
    %139 = vector.broadcast %137 : vector<1x64xf32> to vector<8x64xf32>
    %140 = arith.mulf %138, %139 : vector<8x64xf32>
    %141 = arith.addf %135, %140 : vector<8x64xf32>
    %142 = vector.extract_strided_slice %118 {offsets = [0, 3], sizes = [8, 1], strides = [1, 1]} : vector<8x4xf32> to vector<8x1xf32>
    %143 = vector.extract_strided_slice %123 {offsets = [3, 0], sizes = [1, 64], strides = [1, 1]} : vector<4x64xf32> to vector<1x64xf32>
    %144 = vector.broadcast %142 : vector<8x1xf32> to vector<8x64xf32>
    %145 = vector.broadcast %143 : vector<1x64xf32> to vector<8x64xf32>
    %146 = arith.mulf %144, %145 : vector<8x64xf32>
    %147 = arith.addf %141, %146 : vector<8x64xf32>
    %148 = math.tanh %147 : vector<8x64xf32>
    %c80_38 = arith.constant 80 : index
    %c128_39 = arith.constant 128 : index
    %149 = vector.load %arg3[%c80_38, %c128_39] : memref<224x256xf32, #tpu.memory_space<vmem>>, vector<64x64xf32>
    %cst_40 = arith.constant dense<0.000000e+00> : vector<8x64xf32>
    %150 = tpu.matmul %148, %149, %cst_40 {dimension_numbers = #tpu.dot_dimension_numbers<[1], [0], [0], [1], [0, 0, 1, 1], [], []>} : vector<8x64xf32>, vector<64x64xf32>, vector<8x64xf32> -> vector<8x64xf32>
    %c144_41 = arith.constant 144 : index
    %c128_42 = arith.constant 128 : index
    %151 = vector.load %arg3[%c144_41, %c128_42] : memref<224x256xf32, #tpu.memory_space<vmem>>, vector<1x64xf32>
    %152 = vector.broadcast %151 : vector<1x64xf32> to vector<8x64xf32>
    %153 = arith.addf %150, %152 : vector<8x64xf32>
    %154 = math.tanh %153 : vector<8x64xf32>
    %c152_43 = arith.constant 152 : index
    %c16_44 = arith.constant 16 : index
    %155 = vector.load %arg3[%c152_43, %c16_44] : memref<224x256xf32, #tpu.memory_space<vmem>>, vector<64x8xf32>
    %cst_45 = arith.constant dense<0.000000e+00> : vector<8x8xf32>
    %156 = tpu.matmul %154, %155, %cst_45 {dimension_numbers = #tpu.dot_dimension_numbers<[1], [0], [0], [1], [0, 0, 1, 1], [], []>} : vector<8x64xf32>, vector<64x8xf32>, vector<8x8xf32> -> vector<8x8xf32>
    %c216_46 = arith.constant 216 : index
    %c16_47 = arith.constant 16 : index
    %157 = vector.load %arg3[%c216_46, %c16_47] : memref<224x256xf32, #tpu.memory_space<vmem>>, vector<1x8xf32>
    %158 = vector.broadcast %157 : vector<1x8xf32> to vector<8x8xf32>
    %159 = arith.addf %156, %158 : vector<8x8xf32>
    %160 = vector.extract_strided_slice %159 {offsets = [0, 0], sizes = [8, 4], strides = [1, 1]} : vector<8x8xf32> to vector<8x4xf32>
    %161 = vector.extract_strided_slice %159 {offsets = [0, 4], sizes = [8, 4], strides = [1, 1]} : vector<8x8xf32> to vector<8x4xf32>
    %162 = math.exp %161 : vector<8x4xf32>
    %163 = arith.mulf %72, %162 : vector<8x4xf32>
    %164 = arith.addf %160, %163 : vector<8x4xf32>
    %cst_48 = arith.constant dense<0.000000e+00> : vector<8xf32>
    %165 = vector.multi_reduction <add>, %161, %cst_48 [1] : vector<8x4xf32> to vector<8xf32>
    %166 = vector.shape_cast %165 : vector<8xf32> to vector<8x1xf32>
    %167 = arith.addf %121, %166 : vector<8x1xf32>
    %168 = vector.extract_strided_slice %25 {offsets = [0, 192], sizes = [8, 64], strides = [1, 1]} : vector<8x256xf32> to vector<8x64xf32>
    %c72_49 = arith.constant 72 : index
    %c192 = arith.constant 192 : index
    %169 = vector.load %arg3[%c72_49, %c192] : memref<224x256xf32, #tpu.memory_space<vmem>>, vector<4x64xf32>
    %170 = vector.extract_strided_slice %164 {offsets = [0, 0], sizes = [8, 1], strides = [1, 1]} : vector<8x4xf32> to vector<8x1xf32>
    %171 = vector.extract_strided_slice %169 {offsets = [0, 0], sizes = [1, 64], strides = [1, 1]} : vector<4x64xf32> to vector<1x64xf32>
    %172 = vector.broadcast %170 : vector<8x1xf32> to vector<8x64xf32>
    %173 = vector.broadcast %171 : vector<1x64xf32> to vector<8x64xf32>
    %174 = arith.mulf %172, %173 : vector<8x64xf32>
    %175 = arith.addf %168, %174 : vector<8x64xf32>
    %176 = vector.extract_strided_slice %164 {offsets = [0, 1], sizes = [8, 1], strides = [1, 1]} : vector<8x4xf32> to vector<8x1xf32>
    %177 = vector.extract_strided_slice %169 {offsets = [1, 0], sizes = [1, 64], strides = [1, 1]} : vector<4x64xf32> to vector<1x64xf32>
    %178 = vector.broadcast %176 : vector<8x1xf32> to vector<8x64xf32>
    %179 = vector.broadcast %177 : vector<1x64xf32> to vector<8x64xf32>
    %180 = arith.mulf %178, %179 : vector<8x64xf32>
    %181 = arith.addf %175, %180 : vector<8x64xf32>
    %182 = vector.extract_strided_slice %164 {offsets = [0, 2], sizes = [8, 1], strides = [1, 1]} : vector<8x4xf32> to vector<8x1xf32>
    %183 = vector.extract_strided_slice %169 {offsets = [2, 0], sizes = [1, 64], strides = [1, 1]} : vector<4x64xf32> to vector<1x64xf32>
    %184 = vector.broadcast %182 : vector<8x1xf32> to vector<8x64xf32>
    %185 = vector.broadcast %183 : vector<1x64xf32> to vector<8x64xf32>
    %186 = arith.mulf %184, %185 : vector<8x64xf32>
    %187 = arith.addf %181, %186 : vector<8x64xf32>
    %188 = vector.extract_strided_slice %164 {offsets = [0, 3], sizes = [8, 1], strides = [1, 1]} : vector<8x4xf32> to vector<8x1xf32>
    %189 = vector.extract_strided_slice %169 {offsets = [3, 0], sizes = [1, 64], strides = [1, 1]} : vector<4x64xf32> to vector<1x64xf32>
    %190 = vector.broadcast %188 : vector<8x1xf32> to vector<8x64xf32>
    %191 = vector.broadcast %189 : vector<1x64xf32> to vector<8x64xf32>
    %192 = arith.mulf %190, %191 : vector<8x64xf32>
    %193 = arith.addf %187, %192 : vector<8x64xf32>
    %194 = math.tanh %193 : vector<8x64xf32>
    %c80_50 = arith.constant 80 : index
    %c192_51 = arith.constant 192 : index
    %195 = vector.load %arg3[%c80_50, %c192_51] : memref<224x256xf32, #tpu.memory_space<vmem>>, vector<64x64xf32>
    %cst_52 = arith.constant dense<0.000000e+00> : vector<8x64xf32>
    %196 = tpu.matmul %194, %195, %cst_52 {dimension_numbers = #tpu.dot_dimension_numbers<[1], [0], [0], [1], [0, 0, 1, 1], [], []>} : vector<8x64xf32>, vector<64x64xf32>, vector<8x64xf32> -> vector<8x64xf32>
    %c144_53 = arith.constant 144 : index
    %c192_54 = arith.constant 192 : index
    %197 = vector.load %arg3[%c144_53, %c192_54] : memref<224x256xf32, #tpu.memory_space<vmem>>, vector<1x64xf32>
    %198 = vector.broadcast %197 : vector<1x64xf32> to vector<8x64xf32>
    %199 = arith.addf %196, %198 : vector<8x64xf32>
    %200 = math.tanh %199 : vector<8x64xf32>
    %c152_55 = arith.constant 152 : index
    %c24 = arith.constant 24 : index
    %201 = vector.load %arg3[%c152_55, %c24] : memref<224x256xf32, #tpu.memory_space<vmem>>, vector<64x8xf32>
    %cst_56 = arith.constant dense<0.000000e+00> : vector<8x8xf32>
    %202 = tpu.matmul %200, %201, %cst_56 {dimension_numbers = #tpu.dot_dimension_numbers<[1], [0], [0], [1], [0, 0, 1, 1], [], []>} : vector<8x64xf32>, vector<64x8xf32>, vector<8x8xf32> -> vector<8x8xf32>
    %c216_57 = arith.constant 216 : index
    %c24_58 = arith.constant 24 : index
    %203 = vector.load %arg3[%c216_57, %c24_58] : memref<224x256xf32, #tpu.memory_space<vmem>>, vector<1x8xf32>
    %204 = vector.broadcast %203 : vector<1x8xf32> to vector<8x8xf32>
    %205 = arith.addf %202, %204 : vector<8x8xf32>
    %206 = vector.extract_strided_slice %205 {offsets = [0, 0], sizes = [8, 4], strides = [1, 1]} : vector<8x8xf32> to vector<8x4xf32>
    %207 = vector.extract_strided_slice %205 {offsets = [0, 4], sizes = [8, 4], strides = [1, 1]} : vector<8x8xf32> to vector<8x4xf32>
    %208 = math.exp %207 : vector<8x4xf32>
    %209 = arith.mulf %118, %208 : vector<8x4xf32>
    %210 = arith.addf %206, %209 : vector<8x4xf32>
    %cst_59 = arith.constant dense<0.000000e+00> : vector<8xf32>
    %211 = vector.multi_reduction <add>, %207, %cst_59 [1] : vector<8x4xf32> to vector<8xf32>
    %212 = vector.shape_cast %211 : vector<8xf32> to vector<8x1xf32>
    %213 = arith.addf %167, %212 : vector<8x1xf32>
    %214 = arith.mulf %210, %210 : vector<8x4xf32>
    %cst_60 = arith.constant dense<0.000000e+00> : vector<8xf32>
    %215 = vector.multi_reduction <add>, %214, %cst_60 [1] : vector<8x4xf32> to vector<8xf32>
    %216 = vector.shape_cast %215 : vector<8xf32> to vector<8x1xf32>
    %217 = arith.mulf %164, %164 : vector<8x4xf32>
    %cst_61 = arith.constant dense<0.000000e+00> : vector<8xf32>
    %218 = vector.multi_reduction <add>, %217, %cst_61 [1] : vector<8x4xf32> to vector<8xf32>
    %219 = vector.shape_cast %218 : vector<8xf32> to vector<8x1xf32>
    %220 = arith.addf %216, %219 : vector<8x1xf32>
    %cst_62 = arith.constant -5.000000e-01 : f32
    %221 = vector.broadcast %cst_62 : f32 to vector<8x1xf32>
    %222 = arith.mulf %221, %220 : vector<8x1xf32>
    %cst_63 = arith.constant 7.35150814 : f32
    %223 = vector.broadcast %cst_63 : f32 to vector<8x1xf32>
    %224 = arith.subf %222, %223 : vector<8x1xf32>
    %225 = arith.addf %224, %213 : vector<8x1xf32>
    %226 = vector.shape_cast %225 : vector<8x1xf32> to vector<8x1xf32>
    %227 = vector.broadcast %226 : vector<8x1xf32> to vector<8x128xf32>
    %c0_64 = arith.constant 0 : index
    %c0_65 = arith.constant 0 : index
    %228 = vector.load %arg4[%c0_64, %c0_65] : memref<8x128xf32, #tpu.memory_space<vmem>>, vector<8x128xf32>
    tpu.vector_store %arg4[%c0_64, %c0_65], %227 {strides = array<i32>} : memref<8x128xf32, #tpu.memory_space<vmem>>, vector<8x128xf32>,
    return
  }
  func.func @transform_0(%arg0: i32) -> (i32, i32) {
    %c0_i32 = arith.constant 0 : i32
    %c0_i32_0 = arith.constant 0 : i32
    return %arg0, %c0_i32 : i32, i32
  }
  func.func @transform_1(%arg0: i32) -> (i32, i32) {
    %c0_i32 = arith.constant 0 : i32
    %c0_i32_0 = arith.constant 0 : i32
    return %arg0, %c0_i32 : i32, i32
  }
  func.func @transform_2(%arg0: i32) -> (i32, i32) {
    %c0_i32 = arith.constant 0 : i32
    %c0_i32_0 = arith.constant 0 : i32
    %c0_i32_1 = arith.constant 0 : i32
    return %c0_i32, %c0_i32_0 : i32, i32
  }
  func.func @transform_3(%arg0: i32) -> (i32, i32) {
    %c0_i32 = arith.constant 0 : i32
    %c0_i32_0 = arith.constant 0 : i32
    return %arg0, %c0_i32 : i32, i32
  }
}

</mosaic_0001>

<bundles_post_ra>
// kernel: tpu_custom_call.1
= control target key start
LH: loop header
LB: loop body
LE: loop exit
PB: predicated region body
PF: predicated region fallthrough
CT: control target
= control target key end

     0   :  { %8 = vsyncpa [#allocation3], 0  ;;  %s2372_s0 = inlined_call_operand.hbm [shape: f32[8,16], index: 0, kind: input, shape index: {}]   ;;  %s2373_s1 = inlined_call_operand.hbm [shape: f32[8,8], index: 1, kind: input, shape index: {}]   ;;  %s2374_s2 = inlined_call_operand.hbm [shape: f32[224,256], index: 2, kind: input, shape index: {}]   ;;  %s2375_s3 = inlined_call_operand.hbm [shape: f32[8,128], index: 3, kind: output, shape index: {}]  }
   0x1   :  { %9 = vsyncpa [#allocation6], 0 }
   0x2   :  { %10 = vsyncpa [#allocation4], 0  ;;  %s1932_s12 = smov [#allocation5]   ;;  %s1933_s14 = smov [#allocation2]  }
   0x3   :  { %s27_s13 = sshll.u32 %s1932_s12, 4  ;;  %s17_s15 = sshll.u32 %s1933_s14, 4  ;;  %s28_s13 = int_to_ptr.vmem [resolvable:$true] %s27_s13  ;;  %s18_s15 = int_to_ptr.vmem [resolvable:$true] %s17_s15 }
   0x4   :  { %s1838_s18 = scalar_lea.hbm %s2373_s1, 128 }
   0x5   :  { %p1839_p0 = scmp.ne.s32.totalorder %s2373_s1, %s1838_s18  ;;  %p1842_p1 = scmp.lt.u32.totalorder %s1838_s18, %s2373_s1 }
   0x7   :  { %p1844_p2 = pnand %p1842_p1, %p1839_p0 }
   0x9   :  { %1847 = shalt.err (!%p1844_p2)
}
   0xa   :  { %s1848_s23 = scalar_lea.vmem %s28_s13, 128  ;;  %p1853_p4 = scmp.lt.s32.totalorder %s28_s13, %s28_s13 }
   0xb   :  { %p1849_p3 = scmp.ne.s32.totalorder %s28_s13, %s1848_s23  ;;  %p1854_p5 = scmp.lt.s32.totalorder %s1848_s23, %s1848_s23 }
   0xd   :  { %p1855_p6 = por %p1854_p5, %p1853_p4 }
   0xf   :  { %p1856_p7 = pnand %p1855_p6, %p1849_p3 }
  0x11   :  { %1859 = shalt.err (!%p1856_p7)
}
  0x12   :  { %30 = dma.hbm_to_vmem [thread:$0]  %s2373_s1, 128, %s28_s13, [#allocation6]  }
  0x13   :  { %s1860_s28 = scalar_lea.hbm %s2372_s0, 128 }
  0x14   :  { %p1861_p8 = scmp.ne.s32.totalorder %s2372_s0, %s1860_s28  ;;  %p1864_p9 = scmp.lt.u32.totalorder %s1860_s28, %s2372_s0 }
  0x16   :  { %p1866_p10 = pnand %p1864_p9, %p1861_p8 }
  0x18   :  { %1869 = shalt.err (!%p1866_p10)
}
  0x19   :  { %s1870_s6 = scalar_lea.vmem %s18_s15, 128  ;;  %p1875_p12 = scmp.lt.s32.totalorder %s18_s15, %s18_s15 }
  0x1a   :  { %p1871_p11 = scmp.ne.s32.totalorder %s18_s15, %s1870_s6  ;;  %p1876_p13 = scmp.lt.s32.totalorder %s1870_s6, %s1870_s6 }
  0x1c   :  { %p1877_p0 = por %p1876_p13, %p1875_p12 }
  0x1e   :  { %p1878_p1 = pnand %p1877_p0, %p1871_p11 }
  0x20   :  { %1881 = shalt.err (!%p1878_p1)
}
  0x21   :  { %20 = dma.hbm_to_vmem [thread:$0]  %s2372_s0, 128, %s18_s15, [#allocation3]  }
  0x22   :  { %s1934_s8 = smov [#allocation7]   ;;  %s1882_s12 = scalar_lea.hbm %s2374_s2, 7168 }
  0x23   :  { %s36_s9 = sshll.u32 %s1934_s8, 4  ;;  %p1883_p2 = scmp.ne.s32.totalorder %s2374_s2, %s1882_s12  ;;  %s37_s9 = int_to_ptr.vmem [resolvable:$true] %s36_s9 }
  0x24   :  { %p1886_p3 = scmp.lt.u32.totalorder %s1882_s12, %s2374_s2 }
  0x26   :  { %p1888_p4 = pnand %p1886_p3, %p1883_p2 }
  0x28   :  { %1891 = shalt.err (!%p1888_p4)
}
  0x29   :  { %s1892_s18 = scalar_lea.vmem %s37_s9, 7168  ;;  %p1897_p6 = scmp.lt.s32.totalorder %s37_s9, %s37_s9 }
  0x2a   :  { %p1893_p5 = scmp.ne.s32.totalorder %s37_s9, %s1892_s18  ;;  %p1898_p7 = scmp.lt.s32.totalorder %s1892_s18, %s1892_s18 }
  0x2c   :  { %p1899_p8 = por %p1898_p7, %p1897_p6 }
  0x2e   :  { %p1900_p9 = pnand %p1899_p8, %p1893_p5 }
  0x30   :  { %1903 = shalt.err (!%p1900_p9)
}
  0x31   :  { %s1935_s0 = smov 256   ;;  %s1936_s15 = smov 16  }
  0x32   :  { %42 = dma.hbm_to_vmem [thread:$0]  %s2374_s2, 7168, %s37_s9, [#allocation6], %s1935_s0, %s1935_s0, %s1936_s15  }
  0x33   :  { %1926 = dma.done.wait [#allocation3], 128  }
  0x34   :  { %1927 = vsyncadd [#allocation3], 4294967168 }
  0x35   :  { %1928 = dma.done.wait [#allocation6], 7296  }
  0x36   :  { %1929 = vsyncadd [#allocation6], 4294960000  ;;  %v1937_v0 = vmov 0.0|0.0   ;;  %vm1938_vm0 = vmmov 0   ;;  %v1939_v1 = vmov 0.0   ;;  %v53_v2 = vld [vmem:[#allocation7] sm:$0xff]  ;;  %v219_v47 = vlaneseq }
  0x37   :  { %1574 = vmatprep.subr.bf16.mxu0 %v1937_v0  ;;  %1412 = vmatprep.mubr.msk.f32.mxu0 %vm1938_vm0, %v1939_v1  ;;  %v54_v3 = vld [vmem:[#allocation7 + $0x10] sm:$0xff]  ;;  %vm56_vm1 = vcmask 130048   ;;  %v133_v6 = vld [vmem:[#allocation7 + $0x20] sm:$0xff]  ;;  %v213_v15 = vld [vmem:[#allocation7 + $0x68] sm:$0xff]  ;;  %v1940_v22 = vmov 0   ;;  %v1941_v23 = vmov 2  }
  0x38   :  { %1577 = vmatprep.subr.bf16.mxu1 %v1937_v0  ;;  %1419 = vmatprep.mubr.msk.f32.mxu1 %vm1938_vm0, %v1939_v1  ;;  %v1575_v4 = vpack.c.bf16 %v54_v3, %v53_v2  ;;  %v52_v5 = vld [vmem:[#allocation2] sm:$0xff]  ;;  %v55_v9 = vld [vmem:[#allocation7 + $0x40] ss:$0 sm:$0xff]  ;;  %v215_v16 = vld [vmem:[#allocation7 + $0x78] sm:$0xff]  ;;  %v1942_v24 = vmov 1   ;;  %v1943_v25 = vmov 3  }
  0x39   :  { %v134_v7 = vld [vmem:[#allocation7 + $0x30] sm:$0xff]  ;;  %v1580_v17 = vpack.c.bf16 %v215_v16, %v213_v15  ;;  %v212_v18 = vld [vmem:[#allocation7 + $0x60] sm:$0xff]  ;;  %v2019_v21 = vld [vmem:[#allocation5] sm:$0xff]  ;;  %1698 = vset.pattern.permute.xlu0 %v1940_v22  ;;  %1700 = vset.pattern.permute.xlu1 %v1941_v23  ;;  %v2069_v48 = vshrl.u32 %v219_v47, 7  ;;  %vm356_vm4 = vcmask 523264   ;;  %s1944_s2 = smov 124  }
  0x3a   :  { %1576 = vmatpush3.bf16.msra.mxu0 %v1575_v4  ;;  %v1578_v8 = vpack.c.bf16 %v134_v7, %v133_v6  ;;  %v214_v19 = vld [vmem:[#allocation7 + $0x70] sm:$0xff]  ;;  %307 = vperm.xlu0 %1698, %v2019_v21   ;;  %v2034_v32 = vld [vmem:[#allocation7 + $0xa0] sm:$0xff]  ;;  %s1945_s21 = smov 64   ;;  %s1946_s22 = smov 120   ;;  %vm525_vm5 = vcmask 31744  }
  0x3b   :  { %v1582_v20 = vpack.c.bf16 %v214_v19, %v212_v18  ;;  %1581 = vmatprep.subr.bf16.mxu0 %v1580_v17  ;;  %327 = vperm.xlu1 %1700, %v2019_v21   ;;  %v135_v26 = vld [vmem:[#allocation7 + $0x50] ss:$0 sm:$0xff]  ;;  %v2041_v35 = vld [vmem:[#allocation7 + $0xc0] sm:$0xff]  ;;  %v2072_v49 = vsub.s32 0, %v2069_v48  ;;  %v2075_v52 = vsub.s32 1, %v2069_v48  ;;  %v332_v57 = vsub.s32 2, %v2069_v48 }
  0x3c   :  { %1579 = vmatpush3.bf16.msra.mxu1 %v1578_v8  ;;  %v2036_v33 = vld [vmem:[#allocation7 + $0xb0] sm:$0xff]  ;;  %v2047_v38 = vld [vmem:[#allocation7 + $0xe0] sm:$0xff]  ;;  %v342_v59 = vsub.s32 3, %v2069_v48  ;;  %s1947_s23 = smov 112   ;;  %s1948_s24 = smov 104  }
  0x3d   :  { %1413 = vmatmul.mubr.msk.f32.vlgmr.msra.gmra.mrb[0].mxu0 %vm56_vm1, %v52_v5  ;;  %1584 = vmatprep.subr.bf16.mxu1 %v1937_v0  ;;  %v1585_v34 = vpack.c.bf16 %v2036_v33, %v2034_v32  ;;  %v2043_v36 = vld [vmem:[#allocation7 + $0xd0] sm:$0xff]  ;;  %v2054_v41 = vld [vmem:[#allocation7 + $0x100] sm:$0xff]  ;;  %s1949_s25 = smov [#allocation8]  }
  0x3e   :  { %296 = vmatprep.mubr.f32.mxu0 %v1939_v1  ;;  %1583 = vmatpush1.bf16.msra.mxu0 %v1582_v20  ;;  %v1588_v37 = vpack.c.bf16 %v2043_v36, %v2041_v35  ;;  %v2049_v39 = vld [vmem:[#allocation7 + $0xf0] sm:$0xff]  ;;  %v2064_v45 = vld [vmem:[#allocation7 + $0x140] sm:$0xff]  ;;  %s1308_s26 = sshll.u32 %s1949_s25, 4  ;;  %s1309_s26 = int_to_ptr.vmem [resolvable:$true] %s1308_s26 }
  0x3f   :  { %1596 = vmatprep.subr.bf16.mxu0 %v1937_v0  ;;  %1699 = vset.pattern.permute.xlu0 %v1942_v24  ;;  %v1591_v40 = vpack.c.bf16 %v2049_v39, %v2047_v38  ;;  %v2056_v42 = vld [vmem:[#allocation7 + $0x110] sm:$0xff]  ;;  %v2077_v53 = vld [vmem:[#allocation7 + $0x80] ss:$8 sm:$0x3]  ;;  %s1904_s27 = scalar_lea.vmem %s1309_s26, 128  ;;  %p1909_p11 = scmp.lt.s32.totalorder %s1309_s26, %s1309_s26 }
  0x40   :  { %1701 = vset.pattern.permute.xlu1 %v1943_v25  ;;  %317 = vperm.xlu0 %1699, %v2019_v21   ;;  %v1594_v43 = vpack.c.bf16 %v2056_v42, %v2054_v41  ;;  %v2062_v44 = vld [vmem:[#allocation7 + $0x130] sm:$0xff]  ;;  %v222_v56 = vrot.slane %v2077_v53, %v2072_v49  ;;  %v2111_v15 = vld [vmem:[#allocation7 + $0x160] sm:$0xff]  ;;  %p1905_p10 = scmp.ne.s32.totalorder %s1309_s26, %s1904_s27  ;;  %p1910_p12 = scmp.lt.s32.totalorder %s1904_s27, %s1904_s27 }
  0x41   :  { %337 = vperm.xlu1 %1701, %v2019_v21   ;;  %v1597_v46 = vpack.c.bf16 %v2064_v45, %v2062_v44  ;;  %v304_v51 = vld [vmem:[#allocation7 + $0x90] sm:$0xf]  ;;  %v2117_v18 = vld [vmem:[#allocation7 + $0x180] sm:$0xff] }
  0x42   :  { %v2080_v54 = vrot.slane %v304_v51, %v2072_v49  ;;  %v2086_v58 = vrot.slane %v304_v51, %v2075_v52  ;;  %v2094_v2 = vrot.slane %v304_v51, %v332_v57  ;;  %v2101_v5 = vrot.slane %v304_v51, %v342_v59  ;;  %v2115_v17 = vld [vmem:[#allocation7 + $0x170] sm:$0xff]  ;;  %p1911_p13 = por %p1910_p12, %p1909_p11 }
  0x43   :  { %v1603_v19 = vpack.c.bf16 %v2117_v18, %v2115_v17  ;;  %v2122_v20 = vld [vmem:[#allocation7 + $0x190] sm:$0xff] }
  0x44   :  { %1702 = vset.pattern.permute.xlu0 %v1940_v22  ;;  %p1912_p0 = pnand %p1911_p13, %p1905_p10 }
  0x45   :  { %1703 = vset.pattern.permute.xlu1 %v1942_v24 }
  0xb9   :  { %v308_v50 = vpop.permute.xlu0 %307 }
  0xba   :  { %v328_v55 = vpop.permute.xlu1 %327  ;;  %v314_v61 = vmul.f32 %v2080_v54, %v308_v50 }
  0xbb   :  { %v334_v8 = vmul.f32 %v2094_v2, %v328_v55 }
  0xbf   :  { %v318_v60 = vpop.permute.xlu0 %317 }
  0xc0   :  { %v324_v4 = vmul.f32 %v2086_v58, %v318_v60  ;;  %v338_v6 = vpop.permute.xlu1 %337  ;;  %v1706_v60 = vpack.i.bf16 %v2036_v33, %v2034_v32  ;;  %v1721_v32 = vpack.i.bf16 %v2056_v42, %v2054_v41 }
 0x110   :  { %v126_v10 = vpop.f32.mrb[0].mxu0 }
 0x111   :  { %v127_v11 = vadd.f32 %v126_v10, %v55_v9  ;;  %v1414_v12 = vpop.f32.mrb[1].mxu0  ;;  %v344_v10 = vmul.f32 %v2101_v5, %v338_v6 }
 0x113   :  { %vm130_vm2 = vcmp.gt.f32.partialorder %v127_v11, 0.0  ;;  %v131_v13 = vmul.f32 0.01, %v127_v11 }
 0x115   :  { %v132_v14 = vsel %vm130_vm2, %v127_v11, %v131_v13 }
 0x116   :  { %1420 = vmatmul.mubr.msk.f32.vlgmr.msra.gmra.mrb[0].mxu1 %vm56_vm1, %v132_v14  ;;  %v2109_v14 = vld [vmem:[#allocation7 + $0x150] sm:$0xff] }
 0x117   :  { %1438 = vmatprep.mubr.msk.f32.mxu1 %vm1938_vm0, %v1939_v1  ;;  %1586 = vmatpush3.bf16.msra.mxu1 %v1585_v34  ;;  %v1600_v16 = vpack.c.bf16 %v2111_v15, %v2109_v14 }
 0x118   :  { %1587 = vmatprep.subr.bf16.mxu1 %v1937_v0 }
 0x11b   :  { %1589 = vmatpush3.bf16.msra.mxu1 %v1588_v37  ;;  %v2136_v37 = vld [vmem:[#allocation7 + $0x1b0] ss:$0 sm:$0xff] }
 0x11c   :  { %1590 = vmatprep.subr.bf16.mxu1 %v1937_v0 }
 0x11f   :  { %1592 = vmatpush3.bf16.msra.mxu1 %v1591_v40 }
 0x120   :  { %1593 = vmatprep.subr.bf16.mxu1 %v1937_v0 }
 0x123   :  { %1595 = vmatpush3.bf16.msra.mxu1 %v1594_v43 }
 0x124   :  { %1608 = vmatprep.subr.bf16.mxu1 %v1937_v0 }
 0x1e9   :  { %v205_v27 = vpop.f32.mrb[0].mxu1 }
 0x1ea   :  { %v206_v28 = vadd.f32 %v205_v27, %v135_v26  ;;  %v1421_v29 = vpop.f32.mrb[1].mxu1  ;;  %v2124_v26 = vld [vmem:[#allocation7 + $0x1a0] sm:$0xff] }
 0x1eb   :  { %v1606_v27 = vpack.c.bf16 %v2124_v26, %v2122_v20 }
 0x1ec   :  { %vm209_vm3 = vcmp.gt.f32.partialorder %v206_v28, 0.0  ;;  %v210_v30 = vmul.f32 0.01, %v206_v28 }
 0x1ee   :  { %v211_v31 = vsel %vm209_vm3, %v206_v28, %v210_v30  ;;  %v2130_v28 = vld [vmem:[#allocation7 + $0x120] ss:$0 sm:$0xff] }
 0x1ef   :  { %1320 = vmatmul.mubr.msk.f32.vlgmr.msra.gmra.mrb[2].mxu0 %vm56_vm1, %v211_v31 }
 0x1f0   :  { %1457 = vmatprep.mubr.msk.f32.mxu0 %vm1938_vm0, %v1939_v1  ;;  %1598 = vmatpush3.bf16.msra.mxu0 %v1597_v46 }
 0x1f1   :  { %1599 = vmatprep.subr.bf16.mxu0 %v1937_v0 }
 0x1f4   :  { %1601 = vmatpush3.bf16.msra.mxu0 %v1600_v16 }
 0x1f5   :  { %1602 = vmatprep.subr.bf16.mxu0 %v1937_v0 }
 0x1f8   :  { %1604 = vmatpush3.bf16.msra.mxu0 %v1603_v19 }
 0x1f9   :  { %1605 = vmatprep.subr.bf16.mxu0 %v1937_v0 }
 0x1fc   :  { %1607 = vmatpush3.bf16.msra.mxu0 %v1606_v27 }
 0x1fd   :  { %1620 = vmatprep.subr.bf16.mxu0 %v1937_v0 }
 0x2c2   :  { %v298_v62 = vpop.f32.mrb[2].mxu0 }
 0x2c3   :  { %v2090_v63 = vadd.f32 %v298_v62, %v222_v56  ;;  %v2096_v3 = vpop.f32.mrb[3].mxu0  ;;  %v1716_v62 = vpack.i.bf16 %v2049_v39, %v2047_v38 }
 0x2c5   :  { %v315_v7 = vadd.f32 %v314_v61, %v2090_v63  ;;  %v1711_v61 = vpack.i.bf16 %v2043_v36, %v2041_v35 }
 0x2c7   :  { %v325_v9 = vadd.f32 %v324_v4, %v315_v7 }
 0x2c9   :  { %v335_v11 = vadd.f32 %v334_v8, %v325_v9 }
 0x2cb   :  { %v345_v12 = vadd.f32 %v344_v10, %v335_v11 }
 0x2cd   :  { %1814 = vtanh.f32 %v345_v12 }
 0x2d7   :  { %v1815_v13 = vpop.eup %1814 }
 0x2d8   :  { %1439 = vmatmul.mubr.msk.f32.vlgmr.msra.gmra.mrb[2].mxu1 %vm356_vm4, %v1815_v13 }
 0x2d9   :  { %1476 = vmatprep.mubr.msk.f32.mxu1 %vm1938_vm0, %v1939_v1 }
 0x3ab   :  { %v426_v29 = vpop.f32.mrb[2].mxu1 }
 0x3ac   :  { %v427_v30 = vadd.f32 %v426_v29, %v2130_v28  ;;  %v1440_v31 = vpop.f32.mrb[3].mxu1 }
 0x3ae   :  { %1816 = vtanh.f32 %v427_v30 }
 0x3b8   :  { %v1817_v34 = vpop.eup %1816 }
 0x3b9   :  { %1458 = vmatmul.mubr.msk.f32.vlgmr.msra.gmra.mrb[4].mxu0 %vm356_vm4, %v1817_v34 }
 0x3ba   :  { %1495 = vmatprep.mubr.msk.f32.mxu0 %vm1938_vm0, %v1939_v1 }
 0x48c   :  { %v509_v40 = vpop.f32.mrb[4].mxu0 }
 0x48d   :  { %v2139_v43 = vadd.f32 %v509_v40, %v2136_v37  ;;  %v1459_v46 = vpop.f32.mrb[5].mxu0 }
 0x48f   :  { %v513_v47 = vmul.f32 1.442695, %v2139_v43 }
 0x491   :  { %1818 = vpow2.f32 %v513_v47 }
 0x49b   :  { %v1819_v50 = vpop.eup %1818 }
 0x49c   :  { %v515_v51 = vmul.f32 %v1819_v50, %v2019_v21 }
 0x49e   :  { %517 = vrot.lane.b32.xlu1 %v515_v51, %s1944_s2 }
 0x510   :  { %v518_v55 = vpop.permute.xlu1 %517 }
 0x511   :  { %v2145_v56 = vadd.f32 %v518_v55, %v2139_v43 }
 0x513   :  { %538 = vperm.xlu1 %1703, %v2145_v56   ;;  %532 = vperm.xlu0 %1702, %v2145_v56  }
 0x517   :  { %1704 = vset.pattern.permute.xlu1 %v1941_v23  ;;  %1705 = vset.pattern.permute.xlu0 %v1943_v25 }
 0x518   :  { %544 = vperm.xlu1 %1704, %v2145_v56   ;;  %550 = vperm.xlu0 %1705, %v2145_v56  }
 0x51c   :  { %1707 = vrot.lane.b32.xlu1 %v1706_v60, %s1945_s21  ;;  %1746 = vset.pattern.permute.xlu0 %v1940_v22 }
 0x51d   :  { %1747 = vset.pattern.permute.xlu1 %v1942_v24  ;;  %1717 = vrot.lane.b32.xlu0 %v1716_v62, %s1945_s21 }
 0x520   :  { %1712 = vrot.lane.b32.xlu1 %v1711_v61, %s1945_s21 }
 0x524   :  { %1722 = vrot.lane.b32.xlu1 %v1721_v32, %s1945_s21 }
 0x592   :  { %v539_v33 = vpop.permute.xlu1 %538  ;;  %v533_v4 = vpop.permute.xlu0 %532 }
 0x593   :  { %v535_v35 = vmul.f32 %v533_v4, %v2080_v54  ;;  %v541_v36 = vmul.f32 %v539_v33, %v2086_v58  ;;  %v2174_v54 = vpack.i.bf16 %v2064_v45, %v2062_v44  ;;  %v2185_v45 = vpack.i.bf16 %v2124_v26, %v2122_v20 }
 0x594   :  { %v2195_v20 = vpack.i.bf16 %v2117_v18, %v2115_v17 }
 0x595   :  { %v536_v38 = vadd.f32 %v535_v35, %v2090_v63  ;;  %1727 = vrot.lane.b32.xlu1 %v2174_v54, %s1946_s22 }
 0x597   :  { %v545_v39 = vpop.permute.xlu1 %544  ;;  %v542_v6 = vadd.f32 %v541_v36, %v536_v38  ;;  %v551_v7 = vpop.permute.xlu0 %550 }
 0x598   :  { %v547_v8 = vmul.f32 %v545_v39, %v2094_v2  ;;  %v553_v10 = vmul.f32 %v551_v7, %v2101_v5  ;;  %v2179_v2 = vpack.i.bf16 %v2111_v15, %v2109_v14 }
 0x59a   :  { %v548_v9 = vadd.f32 %v547_v8, %v542_v6  ;;  %1732 = vrot.lane.b32.xlu1 %v2179_v2, %s1946_s22 }
 0x59b   :  { %v1708_v11 = vpop.permute.xlu1 %1707  ;;  %v1718_v13 = vpop.permute.xlu0 %1717 }
 0x59c   :  { %v554_v41 = vadd.f32 %v553_v10, %v548_v9  ;;  %v1710_v42 = vunpack.i.h.bf16 %v1708_v11  ;;  %v1709_v12 = vunpack.i.l.bf16 %v1708_v11  ;;  %v1720_v19 = vunpack.i.h.bf16 %v1718_v13 }
 0x59d   :  { %v1719_v27 = vunpack.i.l.bf16 %v1718_v13 }
 0x59e   :  { %1820 = vtanh.f32 %v554_v41  ;;  %v1609_v58 = vpack.c.bf16 %v1710_v42, %v1709_v12  ;;  %1742 = vrot.lane.b32.xlu1 %v2185_v45, %s1946_s22 }
 0x59f   :  { %v1713_v63 = vpop.permute.xlu1 %1712  ;;  %v1615_v30 = vpack.c.bf16 %v1720_v19, %v1719_v27  ;;  %v2233_v19 = vld [vmem:[#allocation7 + $0xd8] sm:$0xff] }
 0x5a0   :  { %v1715_v5 = vunpack.i.h.bf16 %v1713_v63  ;;  %v1714_v16 = vunpack.i.l.bf16 %v1713_v63  ;;  %1610 = vmatpush3.bf16.msra.mxu1 %v1609_v58  ;;  %v2222_v63 = vld [vmem:[#allocation7 + $0xa8] sm:$0xff] }
 0x5a1   :  { %1611 = vmatprep.subr.bf16.mxu1 %v1937_v0 }
 0x5a2   :  { %v1612_v29 = vpack.c.bf16 %v1715_v5, %v1714_v16  ;;  %v2224_v5 = vld [vmem:[#allocation7 + $0xb8] sm:$0xff]  ;;  %v2231_v16 = vld [vmem:[#allocation7 + $0xc8] sm:$0xff] }
 0x5a3   :  { %v1723_v44 = vpop.permute.xlu1 %1722  ;;  %v1636_v27 = vpack.c.bf16 %v2233_v19, %v2231_v16 }
 0x5a4   :  { %1613 = vmatpush3.bf16.msra.mxu1 %v1612_v29  ;;  %v1725_v31 = vunpack.i.h.bf16 %v1723_v44  ;;  %v1724_v14 = vunpack.i.l.bf16 %v1723_v44  ;;  %v2239_v29 = vld [vmem:[#allocation7 + $0xe8] sm:$0xff]  ;;  %v2241_v44 = vld [vmem:[#allocation7 + $0xf8] sm:$0xff] }
 0x5a5   :  { %1614 = vmatprep.subr.bf16.mxu1 %v1937_v0 }
 0x5a6   :  { %v1618_v34 = vpack.c.bf16 %v1725_v31, %v1724_v14  ;;  %v2246_v31 = vld [vmem:[#allocation7 + $0x108] sm:$0xff]  ;;  %v2248_v14 = vld [vmem:[#allocation7 + $0x118] sm:$0xff] }
 0x5a8   :  { %v1821_v15 = vpop.eup %1820  ;;  %1616 = vmatpush3.bf16.msra.mxu1 %v1615_v30  ;;  %v1639_v30 = vpack.c.bf16 %v2241_v44, %v2239_v29 }
 0x5a9   :  { %557 = vrot.lane.b32.xlu0 %v1821_v15, %s1945_s21  ;;  %1617 = vmatprep.subr.bf16.mxu1 %v1937_v0  ;;  %v226_v15 = vrot.slane %v2077_v53, %v2075_v52 }
 0x5ac   :  { %1619 = vmatpush3.bf16.msra.mxu1 %v1618_v34 }
 0x5ad   :  { %592 = vrot.lane.b32.xlu0 %v2130_v28, %s1945_s21  ;;  %1632 = vmatprep.subr.bf16.mxu1 %v1937_v0 }
 0x5b1   :  { %1737 = vrot.lane.b32.xlu0 %v2195_v20, %s1946_s22 }
 0x5b5   :  { %701 = vrot.lane.b32.xlu0 %v2136_v37, %s1946_s22 }
 0x607   :  { %v1728_v26 = vpop.permute.xlu1 %1727 }
 0x608   :  { %v1730_v40 = vunpack.i.h.bf16 %v1728_v26  ;;  %v1729_v46 = vunpack.i.l.bf16 %v1728_v26 }
 0x60a   :  { %v1621_v47 = vpack.c.bf16 %v1730_v40, %v1729_v46 }
 0x60c   :  { %v1733_v50 = vpop.permute.xlu1 %1732  ;;  %1622 = vmatpush3.bf16.msra.mxu0 %v1621_v47  ;;  %v2268_v47 = vadd.f32 %v2096_v3, %v226_v15 }
 0x60d   :  { %v1735_v51 = vunpack.i.h.bf16 %v1733_v50  ;;  %v1734_v55 = vunpack.i.l.bf16 %v1733_v50  ;;  %1623 = vmatprep.subr.bf16.mxu0 %v1937_v0 }
 0x60f   :  { %v1624_v28 = vpack.c.bf16 %v1735_v51, %v1734_v55 }
 0x610   :  { %v1743_v32 = vpop.permute.xlu1 %1742 }
 0x611   :  { %1625 = vmatpush3.bf16.msra.mxu0 %v1624_v28  ;;  %v1745_v33 = vunpack.i.h.bf16 %v1743_v32  ;;  %v1744_v4 = vunpack.i.l.bf16 %v1743_v32 }
 0x612   :  { %1626 = vmatprep.subr.bf16.mxu0 %v1937_v0 }
 0x613   :  { %v1630_v36 = vpack.c.bf16 %v1745_v33, %v1744_v4 }
 0x61b   :  { %v558_v17 = vpop.permute.xlu0 %557 }
 0x61c   :  { %1477 = vmatmul.mubr.msk.f32.vlgmr.msra.gmra.mrb[4].mxu1 %vm356_vm4, %v558_v17 }
 0x61d   :  { %1514 = vmatprep.mubr.msk.f32.mxu1 %vm1938_vm0, %v1939_v1 }
 0x61f   :  { %v593_v18 = vpop.permute.xlu0 %592 }
 0x623   :  { %v1738_v60 = vpop.permute.xlu0 %1737 }
 0x624   :  { %v1740_v61 = vunpack.i.h.bf16 %v1738_v60  ;;  %v1739_v62 = vunpack.i.l.bf16 %v1738_v60 }
 0x626   :  { %v1627_v35 = vpack.c.bf16 %v1740_v61, %v1739_v62 }
 0x627   :  { %v702_v8 = vpop.permute.xlu0 %701 }
 0x628   :  { %1628 = vmatpush3.bf16.msra.mxu0 %v1627_v35 }
 0x629   :  { %1629 = vmatprep.subr.bf16.mxu0 %v1937_v0 }
 0x62c   :  { %1631 = vmatpush3.bf16.msra.mxu0 %v1630_v36 }
 0x62d   :  { %1644 = vmatprep.subr.bf16.mxu0 %v1937_v0 }
 0x6ef   :  { %v663_v38 = vpop.f32.mrb[4].mxu1 }
 0x6f0   :  { %v664_v39 = vadd.f32 %v663_v38, %v593_v18  ;;  %v1478_v6 = vpop.f32.mrb[5].mxu1 }
 0x6f2   :  { %1822 = vtanh.f32 %v664_v39 }
 0x6fc   :  { %v1823_v7 = vpop.eup %1822 }
 0x6fd   :  { %1496 = vmatmul.mubr.msk.f32.vlgmr.msra.gmra.mrb[6].mxu0 %vm356_vm4, %v1823_v7 }
 0x6fe   :  { %1533 = vmatprep.mubr.msk.f32.mxu0 %vm1938_vm0, %v1939_v1 }
 0x7d0   :  { %v773_v9 = vpop.f32.mrb[6].mxu0 }
 0x7d1   :  { %v2210_v10 = vadd.f32 %v773_v9, %v702_v8  ;;  %v1497_v11 = vpop.f32.mrb[7].mxu0 }
 0x7d3   :  { %v777_v41 = vmul.f32 1.442695, %v2210_v10 }
 0x7d5   :  { %1824 = vpow2.f32 %v777_v41 }
 0x7df   :  { %v1825_v42 = vpop.eup %1824 }
 0x7e0   :  { %780 = vrot.lane.b32.xlu1 %v1825_v42, %s1944_s2  ;;  %v2290_v42 = vld [vmem:[#allocation7 + $0x128] ss:$0 sm:$0xff] }
 0x852   :  { %v781_v12 = vpop.permute.xlu1 %780 }
 0x853   :  { %v783_v13 = vmul.f32 %v781_v12, %v2019_v21  ;;  %v1633_v21 = vpack.c.bf16 %v2224_v5, %v2222_v63 }
 0x855   :  { %v2216_v58 = vadd.f32 %v783_v13, %v2210_v10  ;;  %1634 = vmatpush3.bf16.msra.mxu1 %v1633_v21 }
 0x856   :  { %1635 = vmatprep.subr.bf16.mxu1 %v1937_v0 }
 0x857   :  { %806 = vperm.xlu1 %1747, %v2216_v58   ;;  %796 = vperm.xlu0 %1746, %v2216_v58  }
 0x859   :  { %1637 = vmatpush3.bf16.msra.mxu1 %v1636_v27 }
 0x85a   :  { %1638 = vmatprep.subr.bf16.mxu1 %v1937_v0 }
 0x85b   :  { %1748 = vset.pattern.permute.xlu1 %v1941_v23  ;;  %1749 = vset.pattern.permute.xlu0 %v1943_v25 }
 0x85c   :  { %816 = vperm.xlu1 %1748, %v2216_v58   ;;  %826 = vperm.xlu0 %1749, %v2216_v58  }
 0x85d   :  { %1640 = vmatpush3.bf16.msra.mxu1 %v1639_v30 }
 0x85e   :  { %1641 = vmatprep.subr.bf16.mxu1 %v1937_v0 }
 0x860   :  { %1771 = vset.pattern.permute.xlu1 %v1942_v24  ;;  %1770 = vset.pattern.permute.xlu0 %v1940_v22  ;;  %v1642_v24 = vpack.c.bf16 %v2248_v14, %v2246_v31  ;;  %v793_v22 = vld [vmem:[#allocation7 + $0x98] sm:$0xf] }
 0x861   :  { %1751 = vrot.lane.b32.xlu1 %v2174_v54, %s1947_s23  ;;  %1761 = vrot.lane.b32.xlu0 %v2195_v20, %s1947_s23  ;;  %v2262_v34 = vrot.slane %v793_v22, %v2072_v49  ;;  %v2265_v26 = vrot.slane %v793_v22, %v2075_v52  ;;  %v2273_v51 = vrot.slane %v793_v22, %v332_v57 }
 0x862   :  { %1643 = vmatpush3.bf16.msra.mxu1 %v1642_v24  ;;  %v2279_v49 = vrot.slane %v793_v22, %v342_v59 }
 0x863   :  { %1656 = vmatprep.subr.bf16.mxu1 %v1937_v0 }
 0x865   :  { %1756 = vrot.lane.b32.xlu1 %v2179_v2, %s1947_s23  ;;  %943 = vrot.lane.b32.xlu0 %v2136_v37, %s1947_s23 }
 0x869   :  { %1766 = vrot.lane.b32.xlu1 %v2185_v45, %s1947_s23 }
 0x8d6   :  { %v807_v40 = vpop.permute.xlu1 %806  ;;  %v797_v46 = vpop.permute.xlu0 %796 }
 0x8d7   :  { %v803_v50 = vmul.f32 %v2262_v34, %v797_v46  ;;  %v813_v55 = vmul.f32 %v2265_v26, %v807_v40 }
 0x8d9   :  { %v804_v53 = vadd.f32 %v803_v50, %v2268_v47 }
 0x8db   :  { %v817_v52 = vpop.permute.xlu1 %816  ;;  %v814_v28 = vadd.f32 %v813_v55, %v804_v53  ;;  %v827_v17 = vpop.permute.xlu0 %826 }
 0x8dc   :  { %v823_v3 = vmul.f32 %v2273_v51, %v817_v52  ;;  %v833_v60 = vmul.f32 %v2279_v49, %v827_v17  ;;  %v1784_v52 = vpack.i.bf16 %v2241_v44, %v2239_v29 }
 0x8de   :  { %v824_v18 = vadd.f32 %v823_v3, %v814_v28 }
 0x8df   :  { %v1752_v62 = vpop.permute.xlu1 %1751  ;;  %v1762_v38 = vpop.permute.xlu0 %1761 }
 0x8e0   :  { %v834_v61 = vadd.f32 %v833_v60, %v824_v18  ;;  %v1754_v57 = vunpack.i.h.bf16 %v1752_v62  ;;  %v1753_v32 = vunpack.i.l.bf16 %v1752_v62  ;;  %v1764_v39 = vunpack.i.h.bf16 %v1762_v38 }
 0x8e1   :  { %v1763_v6 = vunpack.i.l.bf16 %v1762_v38 }
 0x8e2   :  { %1826 = vtanh.f32 %v834_v61  ;;  %v1645_v33 = vpack.c.bf16 %v1754_v57, %v1753_v32 }
 0x8e3   :  { %v1757_v4 = vpop.permute.xlu1 %1756  ;;  %v1651_v11 = vpack.c.bf16 %v1764_v39, %v1763_v6  ;;  %v944_v30 = vpop.permute.xlu0 %943 }
 0x8e4   :  { %v1759_v35 = vunpack.i.h.bf16 %v1757_v4  ;;  %v1758_v36 = vunpack.i.l.bf16 %v1757_v4  ;;  %1646 = vmatpush3.bf16.msra.mxu0 %v1645_v33 }
 0x8e5   :  { %1647 = vmatprep.subr.bf16.mxu0 %v1937_v0 }
 0x8e6   :  { %v1648_v48 = vpack.c.bf16 %v1759_v35, %v1758_v36 }
 0x8e7   :  { %v1767_v7 = vpop.permute.xlu1 %1766 }
 0x8e8   :  { %1649 = vmatpush3.bf16.msra.mxu0 %v1648_v48  ;;  %v1769_v8 = vunpack.i.h.bf16 %v1767_v7  ;;  %v1768_v9 = vunpack.i.l.bf16 %v1767_v7 }
 0x8e9   :  { %1650 = vmatprep.subr.bf16.mxu0 %v1937_v0 }
 0x8ea   :  { %v1654_v41 = vpack.c.bf16 %v1769_v8, %v1768_v9 }
 0x8ec   :  { %v1827_v59 = vpop.eup %1826  ;;  %1652 = vmatpush3.bf16.msra.mxu0 %v1651_v11 }
 0x8ed   :  { %1515 = vmatmul.mubr.msk.f32.vlgmr.msra.gmra.mrb[6].mxu1 %vm356_vm4, %v1827_v59  ;;  %1653 = vmatprep.subr.bf16.mxu0 %v1937_v0 }
 0x8ee   :  { %1552 = vmatprep.mubr.msk.f32.mxu1 %vm1938_vm0, %v1939_v1 }
 0x8f0   :  { %1655 = vmatpush3.bf16.msra.mxu0 %v1654_v41 }
 0x8f1   :  { %1668 = vmatprep.subr.bf16.mxu0 %v1937_v0 }
 0x9c0   :  { %v914_v12 = vpop.f32.mrb[6].mxu1 }
 0x9c1   :  { %v915_v13 = vadd.f32 %v914_v12, %v2290_v42  ;;  %v1516_v21 = vpop.f32.mrb[7].mxu1 }
 0x9c3   :  { %1828 = vtanh.f32 %v915_v13 }
 0x9cd   :  { %v1829_v27 = vpop.eup %1828 }
 0x9ce   :  { %1534 = vmatmul.mubr.msk.f32.vlgmr.msra.gmra.mrb[8].mxu0 %vm356_vm4, %v1829_v27 }
 0x9cf   :  { %1571 = vmatprep.mubr.msk.f32.mxu0 %vm1938_vm0, %v1939_v1  ;;  %v1774_v1 = vpack.i.bf16 %v2224_v5, %v2222_v63 }
 0xaa1   :  { %v1015_v24 = vpop.f32.mrb[8].mxu0 }
 0xaa2   :  { %v2296_v22 = vadd.f32 %v1015_v24, %v944_v30  ;;  %v1535_v15 = vpop.f32.mrb[9].mxu0 }
 0xaa4   :  { %v1019_v40 = vmul.f32 1.442695, %v2296_v22 }
 0xaa6   :  { %1830 = vpow2.f32 %v1019_v40 }
 0xab0   :  { %v1831_v46 = vpop.eup %1830 }
 0xab1   :  { %1022 = vrot.lane.b32.xlu1 %v1831_v46, %s1944_s2 }
 0xb23   :  { %v1023_v50 = vpop.permute.xlu1 %1022 }
 0xb24   :  { %v1025_v55 = vmul.f32 %v1023_v50, %v2145_v56  ;;  %v1779_v56 = vpack.i.bf16 %v2233_v19, %v2231_v16 }
 0xb26   :  { %v2302_v53 = vadd.f32 %v1025_v55, %v2296_v22 }
 0xb28   :  { %1043 = vperm.xlu1 %1771, %v2302_v53   ;;  %1037 = vperm.xlu0 %1770, %v2302_v53  }
 0xb2c   :  { %1772 = vset.pattern.permute.xlu1 %v1941_v23  ;;  %1773 = vset.pattern.permute.xlu0 %v1943_v25  ;;  %v1789_v23 = vpack.i.bf16 %v2248_v14, %v2246_v31 }
 0xb2d   :  { %1049 = vperm.xlu1 %1772, %v2302_v53   ;;  %1055 = vperm.xlu0 %1773, %v2302_v53  }
 0xb31   :  { %1775 = vrot.lane.b32.xlu1 %v1774_v1, %s1945_s21  ;;  %1785 = vrot.lane.b32.xlu0 %v1784_v52, %s1945_s21 }
 0xb35   :  { %1780 = vrot.lane.b32.xlu1 %v1779_v56, %s1945_s21 }
 0xb39   :  { %1790 = vrot.lane.b32.xlu1 %v1789_v23, %s1945_s21 }
 0xb3d   :  { %1795 = vrot.lane.b32.xlu1 %v2174_v54, %s1948_s24 }
 0xb41   :  { %1800 = vrot.lane.b32.xlu1 %v2179_v2, %s1948_s24 }
 0xb45   :  { %1810 = vrot.lane.b32.xlu1 %v2185_v45, %s1948_s24 }
 0xba7   :  { %v1044_v25 = vpop.permute.xlu1 %1043  ;;  %v1038_v28 = vpop.permute.xlu0 %1037 }
 0xba8   :  { %v1040_v63 = vmul.f32 %v1038_v28, %v2262_v34  ;;  %v1046_v5 = vmul.f32 %v1044_v25, %v2265_v26 }
 0xbaa   :  { %v1041_v16 = vadd.f32 %v1040_v63, %v2268_v47 }
 0xbac   :  { %v1050_v19 = vpop.permute.xlu1 %1049  ;;  %v1047_v17 = vadd.f32 %v1046_v5, %v1041_v16  ;;  %v1056_v29 = vpop.permute.xlu0 %1055 }
 0xbad   :  { %v1052_v44 = vmul.f32 %v1050_v19, %v2273_v51  ;;  %v1058_v18 = vmul.f32 %v1056_v29, %v2279_v49 }
 0xbaf   :  { %v1053_v3 = vadd.f32 %v1052_v44, %v1047_v17 }
 0xbb0   :  { %v1776_v60 = vpop.permute.xlu1 %1775  ;;  %v1786_v62 = vpop.permute.xlu0 %1785 }
 0xbb1   :  { %v1059_v31 = vadd.f32 %v1058_v18, %v1053_v3  ;;  %v1778_v14 = vunpack.i.h.bf16 %v1776_v60  ;;  %v1777_v61 = vunpack.i.l.bf16 %v1776_v60  ;;  %v1788_v47 = vunpack.i.h.bf16 %v1786_v62 }
 0xbb2   :  { %v1787_v33 = vunpack.i.l.bf16 %v1786_v62  ;;  %v1293_v3 = vmul.f32 %v2302_v53, %v2302_v53 }
 0xbb3   :  { %1832 = vtanh.f32 %v1059_v31  ;;  %v1657_v57 = vpack.c.bf16 %v1778_v14, %v1777_v61 }
 0xbb4   :  { %v1781_v34 = vpop.permute.xlu1 %1780  ;;  %v1663_v35 = vpack.c.bf16 %v1788_v47, %v1787_v33 }
 0xbb5   :  { %v1783_v32 = vunpack.i.h.bf16 %v1781_v34  ;;  %v1782_v26 = vunpack.i.l.bf16 %v1781_v34  ;;  %1658 = vmatpush3.bf16.msra.mxu1 %v1657_v57 }
 0xbb6   :  { %1659 = vmatprep.subr.bf16.mxu1 %v1937_v0 }
 0xbb7   :  { %v1660_v4 = vpack.c.bf16 %v1783_v32, %v1782_v26 }
 0xbb8   :  { %v1791_v51 = vpop.permute.xlu1 %1790 }
 0xbb9   :  { %1661 = vmatpush3.bf16.msra.mxu1 %v1660_v4  ;;  %v1793_v49 = vunpack.i.h.bf16 %v1791_v51  ;;  %v1792_v36 = vunpack.i.l.bf16 %v1791_v51 }
 0xbba   :  { %1662 = vmatprep.subr.bf16.mxu1 %v1937_v0 }
 0xbbb   :  { %v1666_v59 = vpack.c.bf16 %v1793_v49, %v1792_v36 }
 0xbbd   :  { %v1833_v48 = vpop.eup %1832  ;;  %1664 = vmatpush3.bf16.msra.mxu1 %v1663_v35 }
 0xbbe   :  { %1062 = vrot.lane.b32.xlu0 %v1833_v48, %s1945_s21  ;;  %1665 = vmatprep.subr.bf16.mxu1 %v1937_v0 }
 0xbc1   :  { %1667 = vmatpush3.bf16.msra.mxu1 %v1666_v59 }
 0xbc2   :  { %1097 = vrot.lane.b32.xlu0 %v2290_v42, %s1945_s21 }
 0xbc6   :  { %1805 = vrot.lane.b32.xlu0 %v2195_v20, %s1948_s24 }
 0xbca   :  { %1197 = vrot.lane.b32.xlu0 %v2136_v37, %s1948_s24 }
 0xbce   :  { %522 = vrot.lane.b32.xlu0 %v2139_v43, %s1944_s2  ;;  %v1796_v43 = vpop.permute.xlu1 %1795 }
 0xbcf   :  { %v1798_v45 = vunpack.i.h.bf16 %v1796_v43  ;;  %v1797_v8 = vunpack.i.l.bf16 %v1796_v43 }
 0xbd1   :  { %v1669_v9 = vpack.c.bf16 %v1798_v45, %v1797_v8 }
 0xbd2   :  { %1028 = vrot.lane.b32.xlu0 %v2296_v22, %s1944_s2  ;;  %v1801_v11 = vpop.permute.xlu1 %1800 }
 0xbd3   :  { %v1803_v12 = vunpack.i.h.bf16 %v1801_v11  ;;  %v1802_v13 = vunpack.i.l.bf16 %v1801_v11  ;;  %1670 = vmatpush3.bf16.msra.mxu0 %v1669_v9 }
 0xbd4   :  { %1671 = vmatprep.subr.bf16.mxu0 %v1937_v0 }
 0xbd5   :  { %v1672_v21 = vpack.c.bf16 %v1803_v12, %v1802_v13 }
 0xbd6   :  { %v1811_v30 = vpop.permute.xlu1 %1810 }
 0xbd7   :  { %1673 = vmatpush3.bf16.msra.mxu0 %v1672_v21  ;;  %v1813_v24 = vunpack.i.h.bf16 %v1811_v30  ;;  %v1812_v22 = vunpack.i.l.bf16 %v1811_v30 }
 0xbd8   :  { %1674 = vmatprep.subr.bf16.mxu0 %v1937_v0 }
 0xbd9   :  { %v1678_v15 = vpack.c.bf16 %v1813_v24, %v1812_v22 }
 0xc30   :  { %v1063_v38 = vpop.permute.xlu0 %1062 }
 0xc31   :  { %1553 = vmatmul.mubr.msk.f32.vlgmr.msra.gmra.mrb[8].mxu1 %vm356_vm4, %v1063_v38 }
 0xc34   :  { %v1098_v39 = vpop.permute.xlu0 %1097 }
 0xc38   :  { %v1806_v6 = vpop.permute.xlu0 %1805 }
 0xc39   :  { %v1808_v41 = vunpack.i.h.bf16 %v1806_v6  ;;  %v1807_v42 = vunpack.i.l.bf16 %v1806_v6 }
 0xc3b   :  { %v1675_v27 = vpack.c.bf16 %v1808_v41, %v1807_v42 }
 0xc3c   :  { %v1198_v20 = vpop.permute.xlu0 %1197 }
 0xc3d   :  { %1676 = vmatpush3.bf16.msra.mxu0 %v1675_v27 }
 0xc3e   :  { %1677 = vmatprep.subr.bf16.mxu0 %v1937_v0 }
 0xc40   :  { %v523_v7 = vpop.permute.xlu0 %522 }
 0xc41   :  { %v526_v37 = vsel %vm525_vm5, %v523_v7, 0.0  ;;  %1679 = vmatpush3.bf16.msra.mxu0 %v1678_v15 }
 0xc42   :  { %527 = vadd.xlane.f32.xlu0 %v526_v37 }
 0xc44   :  { %v1029_v54 = vpop.permute.xlu0 %1028 }
 0xc45   :  { %v1031_v2 = vsel %vm525_vm5, %v1029_v54, 0.0 }
 0xc46   :  { %1032 = vadd.xlane.f32.xlu0 %v1031_v2 }
 0xd04   :  { %v1168_v40 = vpop.f32.mrb[8].mxu1 }
 0xd05   :  { %v1169_v46 = vadd.f32 %v1168_v40, %v1098_v39  ;;  %v1554_v50 = vpop.f32.mrb[9].mxu1 }
 0xd07   :  { %1834 = vtanh.f32 %v1169_v46 }
 0xd11   :  { %v1835_v55 = vpop.eup %1834 }
 0xd12   :  { %1572 = vmatmul.mubr.msk.f32.vlgmr.msra.gmra.mrb[10].mxu0 %vm356_vm4, %v1835_v55 }
 0xde5   :  { %v1269_v1 = vpop.f32.mrb[10].mxu0 }
 0xde6   :  { %v1270_v56 = vadd.f32 %v1269_v1, %v1198_v20  ;;  %v1573_v52 = vpop.f32.mrb[11].mxu0 }
 0xde8   :  { %v1273_v23 = vmul.f32 1.442695, %v1270_v56 }
 0xdea   :  { %1836 = vpow2.f32 %v1273_v23 }
 0xdf4   :  { %v1837_v25 = vpop.eup %1836 }
 0xdf5   :  { %1276 = vrot.lane.b32.xlu1 %v1837_v25, %s1944_s2 }
 0xdf9   :  { %786 = vrot.lane.b32.xlu1 %v2210_v10, %s1944_s2  ;;  %v1294_v10 = vsel %vm525_vm5, %v1293_v3, 0.0 }
 0xdfd   :  { %1282 = vrot.lane.b32.xlu1 %v1270_v56, %s1944_s2 }
 0xe67   :  { %v1277_v0 = vpop.permute.xlu1 %1276 }
 0xe68   :  { %v1279_v28 = vmul.f32 %v1277_v0, %v2216_v58  ;;  %v528_v58 = vpop.xlane.xlu0 %527 }
 0xe6a   :  { %v1280_v63 = vadd.f32 %v1279_v28, %v1270_v56 }
 0xe6b   :  { %v787_v5 = vpop.permute.xlu1 %786 }
 0xe6c   :  { %v789_v16 = vsel %vm525_vm5, %v787_v5, 0.0  ;;  %v1289_v19 = vmul.f32 %v1280_v63, %v1280_v63  ;;  %v1033_v18 = vpop.xlane.xlu0 %1032 }
 0xe6d   :  { %790 = vadd.xlane.f32.xlu1 %v789_v16 }
 0xe6e   :  { %v1290_v29 = vsel %vm525_vm5, %v1289_v19, 0.0 }
 0xe6f   :  { %v1283_v17 = vpop.permute.xlu1 %1282 }
 0xe70   :  { %v1285_v44 = vsel %vm525_vm5, %v1283_v17, 0.0 }
 0xe71   :  { %1291 = vadd.xlane.f32.xlu1 %v1290_v29  ;;  %1286 = vadd.xlane.f32.xlu0 %v1285_v44 }
 0xe75   :  { %1295 = vadd.xlane.f32.xlu0 %v1294_v10 }
 0xefa   :  { %v791_v60 = vpop.xlane.xlu1 %790 }
 0xefb   :  { %v792_v14 = vadd.f32 %v791_v60, %v528_v58 }
 0xefd   :  { %v1034_v57 = vadd.f32 %v1033_v18, %v792_v14 }
 0xefe   :  { %v1287_v31 = vpop.xlane.xlu0 %1286  ;;  %v1292_v61 = vpop.xlane.xlu1 %1291 }
 0xeff   :  { %v1288_v26 = vadd.f32 %v1287_v31, %v1034_v57 }
 0xf02   :  { %v1296_v62 = vpop.xlane.xlu0 %1295 }
 0xf03   :  { %v1297_v34 = vadd.f32 %v1296_v62, %v1292_v61 }
 0xf05   :  { %v1298_v32 = vmul.f32 -0.5, %v1297_v34 }
 0xf07   :  { %v1329_v47 = vadd.f32 -7.351508, %v1298_v32 }
 0xf09   :  { %v1300_v53 = vadd.f32 %v1329_v47, %v1288_v26 }
 0xf0b   :  { %1301 = vst [vmem:[#allocation8] sm:$0xff] %v1300_v53 }
 0xf0c   :  { %1915 = shalt.err (!%p1912_p0)
}
 0xf0d   :  { %s1916_s30 = scalar_lea.hbm %s2375_s3, 128 }
 0xf0e   :  { %p1917_p1 = scmp.ne.s32.totalorder %s2375_s3, %s1916_s30  ;;  %p1920_p2 = scmp.lt.u32.totalorder %s1916_s30, %s2375_s3 }
 0xf10   :  { %p1922_p3 = pnand %p1920_p2, %p1917_p1 }
 0xf12   :  { %1925 = shalt.err (!%p1922_p3)
}
 0xf13   :  { %1311 = dma.vmem_to_hbm [thread:$0]  %s1309_s26, 128, %s2375_s3, [#allocation4]  }
 0xf14   :  { %1930 = dma.done.wait [#allocation4], 128  }
 0xf15   :  { %1931 = vsyncadd [#allocation4], 4294967168 }
 0xf16   :  { %1315 = vsyncpa [#allocation3], 1 }
 0xf17   :  { %1316 = vsyncpa [#allocation6], 1 }
 0xf18   :  { %1317 = vsyncpa [#allocation4], 1 }

</bundles_post_ra>
